<compile_context>
chip_gen: v6e
topology: v6e:2x2x1
jax: 0.10.0
libtpu: 0.0.40
codegen_flags: <defaults>
</compile_context>

<pallas_src>
import numpy as np
import jax
import jax.numpy as jnp
from jax.experimental import pallas as pl
from jax.experimental.pallas import tpu as pltpu

LANES = 128    # channel axes padded to one full lane register
SEG_SUB = 8    # seg channels padded to one sublane tile (num_seg <= 8)

# weight-slab block indices
W_STEM, W_B2, W_B3, W_B4, W_ASPP, W_HEAD, W_CFA, W_CF2, W_CF3, W_CF4 = range(10)
# bias-slab row indices
B_STEM, B_B2, B_B3, B_B4, B_ASPP, B_HEAD, B_CLS = range(7)


# ----------------------------------------------------------------------------
# Bilinear interpolation matrix (matches F.interpolate align_corners=False)
# ----------------------------------------------------------------------------
def _interp_matrix(out_size, in_size):
    scale = in_size / out_size
    src = (np.arange(out_size, dtype=np.float64) + 0.5) * scale - 0.5
    src = np.maximum(src, 0.0)
    i0 = np.minimum(np.floor(src).astype(np.int64), in_size - 1)
    i1 = np.minimum(i0 + 1, in_size - 1)
    frac = src - i0
    M = np.zeros((out_size, in_size), np.float32)
    M[np.arange(out_size), i0] += (1.0 - frac).astype(np.float32)
    M[np.arange(out_size), i1] += frac.astype(np.float32)
    return M


# ----------------------------------------------------------------------------
# One-time parameter prep: pack / pad / split / cast everything off the
# per-call critical path.
# ----------------------------------------------------------------------------
def prepare_params(params, H, W):
    assert H % 4 == 0 and W % 4 == 0, (H, W)
    h, w = H // 4, W // 4

    num_seg = params["head_w"].shape[1]
    num_cls = params["cls_w"].shape[1]
    assert num_seg <= SEG_SUB, num_seg
    assert num_cls <= LANES, num_cls
    for k, v in params.items():
        assert v.shape[-1] <= LANES, (k, v.shape)

    def wblock(wmat):
        wmat = np.asarray(wmat, np.float32)
        cin, cout = wmat.shape
        assert cin <= LANES and cout <= LANES, wmat.shape
        blk = np.zeros((LANES, LANES), np.float32)
        blk[:cin, :cout] = wmat
        return blk

    # Split the classifier weight along the concat(aspp, out_2, out_3, out_4)
    # input axis: mean(concat(f_i)) @ W == sum_i mean(f_i) @ W_i.
    c_fa = params["aspp_w"].shape[1]
    c2 = params["b2_w"].shape[1]
    c3 = params["b3_w"].shape[1]
    o0, o1, o2 = c_fa, c_fa + c2, c_fa + c2 + c3
    cw = np.asarray(params["cls_w"], np.float32)

    wslab = np.stack([
        wblock(params["stem_w"]), wblock(params["b2_w"]),
        wblock(params["b3_w"]), wblock(params["b4_w"]),
        wblock(params["aspp_w"]), wblock(params["head_w"]),
        wblock(cw[:o0]), wblock(cw[o0:o1]), wblock(cw[o1:o2]), wblock(cw[o2:]),
    ])                                                       # (10, 128, 128)

    def brow(b):
        b = np.asarray(b, np.float32).reshape(-1)
        row = np.zeros((LANES,), np.float32)
        row[: b.shape[0]] = b
        return row

    bslab = np.stack([brow(params[k]) for k in
                      ("stem_b", "b2_b", "b3_b", "b4_b",
                       "aspp_b", "head_b", "cls_b")])[:, None, :]   # (7,1,128)

    # Bilinear (align_corners=False) upsample as kron(A_H, A_W), stored
    # transposed so the kernel can apply it channel-major.
    # TODO(synk): for large resolutions switch to a separable (A_W then A_H)
    # upsample + tile the output rows so the kron matrix / output block do not
    # outgrow v7x's 64 MiB VMEM; set vmem_limit_bytes explicitly at that point.
    kmat = np.kron(_interp_matrix(H, h), _interp_matrix(W, w))      # (HW, hw)

    return {
        "wslab": jnp.asarray(wslab, jnp.bfloat16),
        "bslab": jnp.asarray(bslab, jnp.float32),
        "kmatT": jnp.asarray(kmat.T, jnp.bfloat16),                 # (hw, HW)
        "num_seg": int(num_seg),
        "num_cls": int(num_cls),
    }


# ----------------------------------------------------------------------------
# Fused kernel: single invocation, everything VMEM-resident.
#   x_ref   : (N*hw, 128)    bf16  (subsampled pixels, lane-padded channels)
#   w_ref   : (10, 128, 128) bf16  (all conv / classifier weights)
#   b_ref   : (7, 1, 128)    f32   (all biases)
#   kt_ref  : (hw, H*W)      bf16  (transposed kron bilinear matrix)
#   seg_ref : (N, 8, H*W)    f32   (channel-major segmentation logits)
#   cls_ref : (N, 1, 128)    f32   (scene-classifier logits)
# ----------------------------------------------------------------------------
def _fused_kernel(x_ref, w_ref, b_ref, kt_ref, seg_ref, cls_ref):
    def pw(t, wi, bi, relu=True):
        y = jnp.dot(t.astype(jnp.bfloat16), w_ref[wi],
                    preferred_element_type=jnp.float32) + b_ref[bi]
        return jnp.maximum(y, 0.0) if relu else y

    xb = x_ref[...]                                   # (M, 128), M = N*hw
    h1 = pw(xb, W_STEM, B_STEM)                       # stem
    f2 = pw(h1, W_B2, B_B2)                           # backbone out_2
    f3 = pw(f2, W_B3, B_B3)                           # backbone out_3
    f4 = pw(f3, W_B4, B_B4)                           # backbone out_4
    fa = pw(f4, W_ASPP, B_ASPP)                       # aspp
    seg_lo = pw(fa, W_HEAD, B_HEAD, relu=False)       # deeplab head, (M, 128)

    kt = kt_ref[...]                                  # (hw, HW) bf16
    hw = kt.shape[0]
    n_batch = seg_ref.shape[0]
    cls_bias = b_ref[B_CLS]                           # (1, 128) f32

    for n in range(n_batch):                          # static; N is tiny
        lo, hi = n * hw, (n + 1) * hw

        # Bilinear upsample, channel-major: (8, hw) @ (hw, HW) -> (8, HW).
        # The tiny transpose rides the XLU; output is lane-dense (HW = k*128).
        seg_t = seg_lo[lo:hi].T[:SEG_SUB, :]          # (8, hw)
        seg_ref[n] = jnp.dot(seg_t.astype(jnp.bfloat16), kt,
                             preferred_element_type=jnp.float32)

        # Scene classifier: pool first (sublane reduce), then M=1 projections.
        def pooled_dot(feat, wi):
            p = jnp.mean(feat[lo:hi], axis=0, keepdims=True)       # (1, 128)
            return jnp.dot(p.astype(jnp.bfloat16), w_ref[wi],
                           preferred_element_type=jnp.float32)

        cls_ref[n] = (pooled_dot(fa, W_CFA) + pooled_dot(f2, W_CF2)
                      + pooled_dot(f3, W_CF3) + pooled_dot(f4, W_CF4)
                      + cls_bias)


# ----------------------------------------------------------------------------
# Forward pass wrapper: one fused input-layout op + one pallas_call.
# ----------------------------------------------------------------------------
def scene_parser_forward(x_nchw, wslab, bslab, kmatT, *, num_seg, num_cls):
    N, cin, H, W = x_nchw.shape
    assert H % 4 == 0 and W % 4 == 0, (H, W)
    assert cin <= LANES, cin
    h, w = H // 4, W // 4
    hw, HW = h * w, H * W
    assert kmatT.shape == (hw, HW), (kmatT.shape, hw, HW)

    # Two stride-2 subsamples commute with the (pointwise) backbone convs, so
    # subsample FIRST, fold batch into the matmul M dim, lane-pad channels.
    # Under jit this whole transform is a single copy fusion.
    # TODO(synk): if the backbone ever uses spatial (non-1x1) strided convs,
    # this commutation is no longer exact and the subsample must move back.
    x = jnp.transpose(x_nchw, (0, 2, 3, 1))[:, ::4, ::4, :]
    x = x.reshape(N * hw, cin)
    x = jnp.pad(x, ((0, 0), (0, LANES - cin))).astype(jnp.bfloat16)

    seg_pad, cls_pad = pl.pallas_call(
        _fused_kernel,
        out_shape=(
            jax.ShapeDtypeStruct((N, SEG_SUB, HW), jnp.float32),
            jax.ShapeDtypeStruct((N, 1, LANES), jnp.float32),
        ),
        # Single invocation (no grid): 4 input DMAs total, weights + all
        # activations stay VMEM-resident.  For large batches on v7x, add a
        # batch grid axis marked pltpu.CORE_PARALLEL instead.
        in_specs=[pl.BlockSpec(memory_space=pltpu.MemorySpace.VMEM)] * 4,
        out_specs=(pl.BlockSpec(memory_space=pltpu.MemorySpace.VMEM),
                   pl.BlockSpec(memory_space=pltpu.MemorySpace.VMEM)),
    )(x, wslab, bslab, kmatT)

    # Channel-major seg -> NCHW needs only slice + reshape (no transpose).
    seg = seg_pad[:, :num_seg, :].reshape(N, num_seg, H, W)
    cls = cls_pad[:, 0, :num_cls]
    return {"seg": seg, "cls": cls}


# ----------------------------------------------------------------------------
# Pure-JAX f32 reference (original conv-then-subsample order) for correctness
# ----------------------------------------------------------------------------
def _reference_forward(x_nchw, params):
    N, cin, H, W = x_nchw.shape
    h, w = H // 4, W // 4
    x = jnp.transpose(x_nchw, (0, 2, 3, 1))  # NHWC

    def pw(t, wn, bn, relu=True):
        y = t @ params[wn] + params[bn]
        return jnp.maximum(y, 0.0) if relu else y

    t = pw(x, "stem_w", "stem_b")[:, ::2, ::2, :]
    f2 = pw(t, "b2_w", "b2_b")[:, ::2, ::2, :]
    f3 = pw(f2, "b3_w", "b3_b")
    f4 = pw(f3, "b4_w", "b4_b")
    fa = pw(f4, "aspp_w", "aspp_b")
    seg_lo = pw(fa, "head_w", "head_b", relu=False)          # (N, h, w, num_seg)

    kmat = jnp.asarray(np.kron(_interp_matrix(H, h), _interp_matrix(W, w)))
    seg = jnp.einsum("Pp,npc->nPc", kmat, seg_lo.reshape(N, h * w, -1))
    seg = jnp.transpose(seg.reshape(N, H, W, -1), (0, 3, 1, 2))

    xcat = jnp.concatenate([fa, f2, f3, f4], axis=-1)        # (N, h, w, 168)
    pooled = jnp.mean(xcat.reshape(N, h * w, -1), axis=1)
    cls = pooled @ params["cls_w"] + params["cls_b"]
    return seg, cls


# ----------------------------------------------------------------------------
# Deterministic parameter init (same synthetic submodule shapes as before)
# ----------------------------------------------------------------------------
def init_params(key):
    def dense(k, cin, cout, scale=0.1):
        kw, kb = jax.random.split(k)
        return (
            jax.random.normal(kw, (cin, cout), jnp.float32) * scale,
            jax.random.normal(kb, (1, cout), jnp.float32) * scale,
        )

    keys = jax.random.split(key, 7)
    p = {}
    p["stem_w"], p["stem_b"] = dense(keys[0], 4, 16)
    p["b2_w"], p["b2_b"] = dense(keys[1], 16, 24)
    p["b3_w"], p["b3_b"] = dense(keys[2], 24, 32)
    p["b4_w"], p["b4_b"] = dense(keys[3], 32, 48)
    p["aspp_w"], p["aspp_b"] = dense(keys[4], 48, 64)
    p["head_w"], p["head_b"] = dense(keys[5], 64, 5)                 # 5 seg classes
    p["cls_w"], p["cls_b"] = dense(keys[6], 64 + 24 + 32 + 48, 3)    # 3 scene classes
    return p


if __name__ == "__main__":
    key = jax.random.PRNGKey(0)
    kx, kp = jax.random.split(key)
    x = jax.random.normal(kx, (2, 4, 16, 16), jnp.float32)   # NCHW like PyTorch
    params = init_params(kp)

    prep = prepare_params(params, H=16, W=16)                # one-time prep
    fwd = jax.jit(scene_parser_forward, static_argnames=("num_seg", "num_cls"))

    out = fwd(x, prep["wslab"], prep["bslab"], prep["kmatT"],
              num_seg=prep["num_seg"], num_cls=prep["num_cls"])
    jax.block_until_ready(out)

    assert out["seg"].shape == (2, 5, 16, 16)
    assert out["cls"].shape == (2, 3)
    assert jnp.all(jnp.isfinite(out["seg"])) and jnp.all(jnp.isfinite(out["cls"]))

    seg_ref, cls_ref = _reference_forward(x, params)
    # bf16 MXU operands vs. the f32 reference -> 2e-2 abs tolerance.
    assert float(jnp.max(jnp.abs(out["seg"] - seg_ref))) < 2e-2
    assert float(jnp.max(jnp.abs(out["cls"] - cls_ref))) < 2e-2

    print("KERNEL_OK")
</pallas_src>

<mosaic_0001>
module attributes {stable_mosaic.version = 11 : i64} {
  func.func @_fused_kernel(%arg0: memref<32x128xbf16, #tpu.memory_space<vmem>>, %arg1: memref<10x128x128xbf16, #tpu.memory_space<vmem>>, %arg2: memref<7x1x128xf32, #tpu.memory_space<vmem>>, %arg3: memref<16x256xbf16, #tpu.memory_space<vmem>>, %arg4: memref<2x8x256xf32, #tpu.memory_space<vmem>>, %arg5: memref<2x1x128xf32, #tpu.memory_space<vmem>>) attributes {dimension_semantics = [], scalar_prefetch = 0 : i64, scratch_operands = 0 : i64, tpu.core_type = #tpu.core_type<tc>} {
    %c0 = arith.constant 0 : index
    %c0_0 = arith.constant 0 : index
    %0 = vector.load %arg0[%c0, %c0_0] : memref<32x128xbf16, #tpu.memory_space<vmem>>, vector<32x128xbf16>
    %c0_1 = arith.constant 0 : index
    %c0_2 = arith.constant 0 : index
    %c0_3 = arith.constant 0 : index
    %1 = vector.load %arg1[%c0_1, %c0_2, %c0_3] : memref<10x128x128xbf16, #tpu.memory_space<vmem>>, vector<1x128x128xbf16>
    %2 = vector.shape_cast %1 : vector<1x128x128xbf16> to vector<128x128xbf16>
    %cst = arith.constant dense<0.000000e+00> : vector<32x128xf32>
    %3 = tpu.matmul %0, %2, %cst {dimension_numbers = #tpu.dot_dimension_numbers<[1], [0], [0], [1], [0, 0, 1, 1], [], []>} : vector<32x128xbf16>, vector<128x128xbf16>, vector<32x128xf32> -> vector<32x128xf32>
    %c0_4 = arith.constant 0 : index
    %c0_5 = arith.constant 0 : index
    %c0_6 = arith.constant 0 : index
    %4 = vector.load %arg2[%c0_4, %c0_5, %c0_6] : memref<7x1x128xf32, #tpu.memory_space<vmem>>, vector<1x1x128xf32>
    %5 = vector.shape_cast %4 : vector<1x1x128xf32> to vector<1x128xf32>
    %6 = vector.broadcast %5 : vector<1x128xf32> to vector<32x128xf32>
    %7 = arith.addf %3, %6 : vector<32x128xf32>
    %cst_7 = arith.constant 0.000000e+00 : f32
    %8 = vector.broadcast %cst_7 : f32 to vector<32x128xf32>
    %9 = arith.maximumf %7, %8 : vector<32x128xf32>
    %10 = arith.truncf %9 : vector<32x128xf32> to vector<32x128xbf16>
    %c1 = arith.constant 1 : index
    %c0_8 = arith.constant 0 : index
    %c0_9 = arith.constant 0 : index
    %11 = vector.load %arg1[%c1, %c0_8, %c0_9] : memref<10x128x128xbf16, #tpu.memory_space<vmem>>, vector<1x128x128xbf16>
    %12 = vector.shape_cast %11 : vector<1x128x128xbf16> to vector<128x128xbf16>
    %cst_10 = arith.constant dense<0.000000e+00> : vector<32x128xf32>
    %13 = tpu.matmul %10, %12, %cst_10 {dimension_numbers = #tpu.dot_dimension_numbers<[1], [0], [0], [1], [0, 0, 1, 1], [], []>} : vector<32x128xbf16>, vector<128x128xbf16>, vector<32x128xf32> -> vector<32x128xf32>
    %c1_11 = arith.constant 1 : index
    %c0_12 = arith.constant 0 : index
    %c0_13 = arith.constant 0 : index
    %14 = vector.load %arg2[%c1_11, %c0_12, %c0_13] : memref<7x1x128xf32, #tpu.memory_space<vmem>>, vector<1x1x128xf32>
    %15 = vector.shape_cast %14 : vector<1x1x128xf32> to vector<1x128xf32>
    %16 = vector.broadcast %15 : vector<1x128xf32> to vector<32x128xf32>
    %17 = arith.addf %13, %16 : vector<32x128xf32>
    %cst_14 = arith.constant 0.000000e+00 : f32
    %18 = vector.broadcast %cst_14 : f32 to vector<32x128xf32>
    %19 = arith.maximumf %17, %18 : vector<32x128xf32>
    %20 = arith.truncf %19 : vector<32x128xf32> to vector<32x128xbf16>
    %c2 = arith.constant 2 : index
    %c0_15 = arith.constant 0 : index
    %c0_16 = arith.constant 0 : index
    %21 = vector.load %arg1[%c2, %c0_15, %c0_16] : memref<10x128x128xbf16, #tpu.memory_space<vmem>>, vector<1x128x128xbf16>
    %22 = vector.shape_cast %21 : vector<1x128x128xbf16> to vector<128x128xbf16>
    %cst_17 = arith.constant dense<0.000000e+00> : vector<32x128xf32>
    %23 = tpu.matmul %20, %22, %cst_17 {dimension_numbers = #tpu.dot_dimension_numbers<[1], [0], [0], [1], [0, 0, 1, 1], [], []>} : vector<32x128xbf16>, vector<128x128xbf16>, vector<32x128xf32> -> vector<32x128xf32>
    %c2_18 = arith.constant 2 : index
    %c0_19 = arith.constant 0 : index
    %c0_20 = arith.constant 0 : index
    %24 = vector.load %arg2[%c2_18, %c0_19, %c0_20] : memref<7x1x128xf32, #tpu.memory_space<vmem>>, vector<1x1x128xf32>
    %25 = vector.shape_cast %24 : vector<1x1x128xf32> to vector<1x128xf32>
    %26 = vector.broadcast %25 : vector<1x128xf32> to vector<32x128xf32>
    %27 = arith.addf %23, %26 : vector<32x128xf32>
    %cst_21 = arith.constant 0.000000e+00 : f32
    %28 = vector.broadcast %cst_21 : f32 to vector<32x128xf32>
    %29 = arith.maximumf %27, %28 : vector<32x128xf32>
    %30 = arith.truncf %29 : vector<32x128xf32> to vector<32x128xbf16>
    %c3 = arith.constant 3 : index
    %c0_22 = arith.constant 0 : index
    %c0_23 = arith.constant 0 : index
    %31 = vector.load %arg1[%c3, %c0_22, %c0_23] : memref<10x128x128xbf16, #tpu.memory_space<vmem>>, vector<1x128x128xbf16>
    %32 = vector.shape_cast %31 : vector<1x128x128xbf16> to vector<128x128xbf16>
    %cst_24 = arith.constant dense<0.000000e+00> : vector<32x128xf32>
    %33 = tpu.matmul %30, %32, %cst_24 {dimension_numbers = #tpu.dot_dimension_numbers<[1], [0], [0], [1], [0, 0, 1, 1], [], []>} : vector<32x128xbf16>, vector<128x128xbf16>, vector<32x128xf32> -> vector<32x128xf32>
    %c3_25 = arith.constant 3 : index
    %c0_26 = arith.constant 0 : index
    %c0_27 = arith.constant 0 : index
    %34 = vector.load %arg2[%c3_25, %c0_26, %c0_27] : memref<7x1x128xf32, #tpu.memory_space<vmem>>, vector<1x1x128xf32>
    %35 = vector.shape_cast %34 : vector<1x1x128xf32> to vector<1x128xf32>
    %36 = vector.broadcast %35 : vector<1x128xf32> to vector<32x128xf32>
    %37 = arith.addf %33, %36 : vector<32x128xf32>
    %cst_28 = arith.constant 0.000000e+00 : f32
    %38 = vector.broadcast %cst_28 : f32 to vector<32x128xf32>
    %39 = arith.maximumf %37, %38 : vector<32x128xf32>
    %40 = arith.truncf %39 : vector<32x128xf32> to vector<32x128xbf16>
    %c4 = arith.constant 4 : index
    %c0_29 = arith.constant 0 : index
    %c0_30 = arith.constant 0 : index
    %41 = vector.load %arg1[%c4, %c0_29, %c0_30] : memref<10x128x128xbf16, #tpu.memory_space<vmem>>, vector<1x128x128xbf16>
    %42 = vector.shape_cast %41 : vector<1x128x128xbf16> to vector<128x128xbf16>
    %cst_31 = arith.constant dense<0.000000e+00> : vector<32x128xf32>
    %43 = tpu.matmul %40, %42, %cst_31 {dimension_numbers = #tpu.dot_dimension_numbers<[1], [0], [0], [1], [0, 0, 1, 1], [], []>} : vector<32x128xbf16>, vector<128x128xbf16>, vector<32x128xf32> -> vector<32x128xf32>
    %c4_32 = arith.constant 4 : index
    %c0_33 = arith.constant 0 : index
    %c0_34 = arith.constant 0 : index
    %44 = vector.load %arg2[%c4_32, %c0_33, %c0_34] : memref<7x1x128xf32, #tpu.memory_space<vmem>>, vector<1x1x128xf32>
    %45 = vector.shape_cast %44 : vector<1x1x128xf32> to vector<1x128xf32>
    %46 = vector.broadcast %45 : vector<1x128xf32> to vector<32x128xf32>
    %47 = arith.addf %43, %46 : vector<32x128xf32>
    %cst_35 = arith.constant 0.000000e+00 : f32
    %48 = vector.broadcast %cst_35 : f32 to vector<32x128xf32>
    %49 = arith.maximumf %47, %48 : vector<32x128xf32>
    %50 = arith.truncf %49 : vector<32x128xf32> to vector<32x128xbf16>
    %c5 = arith.constant 5 : index
    %c0_36 = arith.constant 0 : index
    %c0_37 = arith.constant 0 : index
    %51 = vector.load %arg1[%c5, %c0_36, %c0_37] : memref<10x128x128xbf16, #tpu.memory_space<vmem>>, vector<1x128x128xbf16>
    %52 = vector.shape_cast %51 : vector<1x128x128xbf16> to vector<128x128xbf16>
    %cst_38 = arith.constant dense<0.000000e+00> : vector<32x128xf32>
    %53 = tpu.matmul %50, %52, %cst_38 {dimension_numbers = #tpu.dot_dimension_numbers<[1], [0], [0], [1], [0, 0, 1, 1], [], []>} : vector<32x128xbf16>, vector<128x128xbf16>, vector<32x128xf32> -> vector<32x128xf32>
    %c5_39 = arith.constant 5 : index
    %c0_40 = arith.constant 0 : index
    %c0_41 = arith.constant 0 : index
    %54 = vector.load %arg2[%c5_39, %c0_40, %c0_41] : memref<7x1x128xf32, #tpu.memory_space<vmem>>, vector<1x1x128xf32>
    %55 = vector.shape_cast %54 : vector<1x1x128xf32> to vector<1x128xf32>
    %56 = vector.broadcast %55 : vector<1x128xf32> to vector<32x128xf32>
    %57 = arith.addf %53, %56 : vector<32x128xf32>
    %c0_42 = arith.constant 0 : index
    %c0_43 = arith.constant 0 : index
    %58 = vector.load %arg3[%c0_42, %c0_43] : memref<16x256xbf16, #tpu.memory_space<vmem>>, vector<16x256xbf16>
    %c6 = arith.constant 6 : index
    %c0_44 = arith.constant 0 : index
    %c0_45 = arith.constant 0 : index
    %59 = vector.load %arg2[%c6, %c0_44, %c0_45] : memref<7x1x128xf32, #tpu.memory_space<vmem>>, vector<1x1x128xf32>
    %60 = vector.shape_cast %59 : vector<1x1x128xf32> to vector<1x128xf32>
    %61 = vector.extract_strided_slice %57 {offsets = [0, 0], sizes = [16, 128], strides = [1, 1]} : vector<32x128xf32> to vector<16x128xf32>
    %62 = tpu.transpose %61, [1, 0] : vector<16x128xf32> -> vector<128x16xf32>
    %63 = vector.extract_strided_slice %62 {offsets = [0, 0], sizes = [8, 16], strides = [1, 1]} : vector<128x16xf32> to vector<8x16xf32>
    %64 = arith.truncf %63 : vector<8x16xf32> to vector<8x16xbf16>
    %cst_46 = arith.constant dense<0.000000e+00> : vector<8x256xf32>
    %65 = tpu.matmul %64, %58, %cst_46 {dimension_numbers = #tpu.dot_dimension_numbers<[1], [0], [0], [1], [0, 0, 1, 1], [], []>} : vector<8x16xbf16>, vector<16x256xbf16>, vector<8x256xf32> -> vector<8x256xf32>
    %c0_47 = arith.constant 0 : index
    %c0_48 = arith.constant 0 : index
    %c0_49 = arith.constant 0 : index
    %66 = vector.load %arg4[%c0_47, %c0_48, %c0_49] : memref<2x8x256xf32, #tpu.memory_space<vmem>>, vector<1x8x256xf32>
    %67 = vector.shape_cast %66 : vector<1x8x256xf32> to vector<8x256xf32>
    %68 = vector.shape_cast %65 : vector<8x256xf32> to vector<1x8x256xf32>
    tpu.vector_store %arg4[%c0_47, %c0_48, %c0_49], %68 {strides = array<i32>} : memref<2x8x256xf32, #tpu.memory_space<vmem>>, vector<1x8x256xf32>,
    %69 = vector.extract_strided_slice %49 {offsets = [0, 0], sizes = [16, 128], strides = [1, 1]} : vector<32x128xf32> to vector<16x128xf32>
    %cst_50 = arith.constant dense<0.000000e+00> : vector<128xf32>
    %70 = vector.multi_reduction <add>, %69, %cst_50 [0] : vector<16x128xf32> to vector<128xf32>
    %71 = vector.shape_cast %70 : vector<128xf32> to vector<1x128xf32>
    %cst_51 = arith.constant 1.600000e+01 : f32
    %72 = vector.broadcast %cst_51 : f32 to vector<1x128xf32>
    %73 = arith.divf %71, %72 : vector<1x128xf32>
    %74 = arith.truncf %73 : vector<1x128xf32> to vector<1x128xbf16>
    %c6_52 = arith.constant 6 : index
    %c0_53 = arith.constant 0 : index
    %c0_54 = arith.constant 0 : index
    %75 = vector.load %arg1[%c6_52, %c0_53, %c0_54] : memref<10x128x128xbf16, #tpu.memory_space<vmem>>, vector<1x128x128xbf16>
    %76 = vector.shape_cast %75 : vector<1x128x128xbf16> to vector<128x128xbf16>
    %cst_55 = arith.constant dense<0.000000e+00> : vector<1x128xf32>
    %77 = tpu.matmul %74, %76, %cst_55 {dimension_numbers = #tpu.dot_dimension_numbers<[1], [0], [0], [1], [0, 0, 1, 1], [], []>} : vector<1x128xbf16>, vector<128x128xbf16>, vector<1x128xf32> -> vector<1x128xf32>
    %78 = vector.extract_strided_slice %19 {offsets = [0, 0], sizes = [16, 128], strides = [1, 1]} : vector<32x128xf32> to vector<16x128xf32>
    %cst_56 = arith.constant dense<0.000000e+00> : vector<128xf32>
    %79 = vector.multi_reduction <add>, %78, %cst_56 [0] : vector<16x128xf32> to vector<128xf32>
    %80 = vector.shape_cast %79 : vector<128xf32> to vector<1x128xf32>
    %cst_57 = arith.constant 1.600000e+01 : f32
    %81 = vector.broadcast %cst_57 : f32 to vector<1x128xf32>
    %82 = arith.divf %80, %81 : vector<1x128xf32>
    %83 = arith.truncf %82 : vector<1x128xf32> to vector<1x128xbf16>
    %c7 = arith.constant 7 : index
    %c0_58 = arith.constant 0 : index
    %c0_59 = arith.constant 0 : index
    %84 = vector.load %arg1[%c7, %c0_58, %c0_59] : memref<10x128x128xbf16, #tpu.memory_space<vmem>>, vector<1x128x128xbf16>
    %85 = vector.shape_cast %84 : vector<1x128x128xbf16> to vector<128x128xbf16>
    %cst_60 = arith.constant dense<0.000000e+00> : vector<1x128xf32>
    %86 = tpu.matmul %83, %85, %cst_60 {dimension_numbers = #tpu.dot_dimension_numbers<[1], [0], [0], [1], [0, 0, 1, 1], [], []>} : vector<1x128xbf16>, vector<128x128xbf16>, vector<1x128xf32> -> vector<1x128xf32>
    %87 = arith.addf %77, %86 : vector<1x128xf32>
    %88 = vector.extract_strided_slice %29 {offsets = [0, 0], sizes = [16, 128], strides = [1, 1]} : vector<32x128xf32> to vector<16x128xf32>
    %cst_61 = arith.constant dense<0.000000e+00> : vector<128xf32>
    %89 = vector.multi_reduction <add>, %88, %cst_61 [0] : vector<16x128xf32> to vector<128xf32>
    %90 = vector.shape_cast %89 : vector<128xf32> to vector<1x128xf32>
    %cst_62 = arith.constant 1.600000e+01 : f32
    %91 = vector.broadcast %cst_62 : f32 to vector<1x128xf32>
    %92 = arith.divf %90, %91 : vector<1x128xf32>
    %93 = arith.truncf %92 : vector<1x128xf32> to vector<1x128xbf16>
    %c8 = arith.constant 8 : index
    %c0_63 = arith.constant 0 : index
    %c0_64 = arith.constant 0 : index
    %94 = vector.load %arg1[%c8, %c0_63, %c0_64] : memref<10x128x128xbf16, #tpu.memory_space<vmem>>, vector<1x128x128xbf16>
    %95 = vector.shape_cast %94 : vector<1x128x128xbf16> to vector<128x128xbf16>
    %cst_65 = arith.constant dense<0.000000e+00> : vector<1x128xf32>
    %96 = tpu.matmul %93, %95, %cst_65 {dimension_numbers = #tpu.dot_dimension_numbers<[1], [0], [0], [1], [0, 0, 1, 1], [], []>} : vector<1x128xbf16>, vector<128x128xbf16>, vector<1x128xf32> -> vector<1x128xf32>
    %97 = arith.addf %87, %96 : vector<1x128xf32>
    %98 = vector.extract_strided_slice %39 {offsets = [0, 0], sizes = [16, 128], strides = [1, 1]} : vector<32x128xf32> to vector<16x128xf32>
    %cst_66 = arith.constant dense<0.000000e+00> : vector<128xf32>
    %99 = vector.multi_reduction <add>, %98, %cst_66 [0] : vector<16x128xf32> to vector<128xf32>
    %100 = vector.shape_cast %99 : vector<128xf32> to vector<1x128xf32>
    %cst_67 = arith.constant 1.600000e+01 : f32
    %101 = vector.broadcast %cst_67 : f32 to vector<1x128xf32>
    %102 = arith.divf %100, %101 : vector<1x128xf32>
    %103 = arith.truncf %102 : vector<1x128xf32> to vector<1x128xbf16>
    %c9 = arith.constant 9 : index
    %c0_68 = arith.constant 0 : index
    %c0_69 = arith.constant 0 : index
    %104 = vector.load %arg1[%c9, %c0_68, %c0_69] : memref<10x128x128xbf16, #tpu.memory_space<vmem>>, vector<1x128x128xbf16>
    %105 = vector.shape_cast %104 : vector<1x128x128xbf16> to vector<128x128xbf16>
    %cst_70 = arith.constant dense<0.000000e+00> : vector<1x128xf32>
    %106 = tpu.matmul %103, %105, %cst_70 {dimension_numbers = #tpu.dot_dimension_numbers<[1], [0], [0], [1], [0, 0, 1, 1], [], []>} : vector<1x128xbf16>, vector<128x128xbf16>, vector<1x128xf32> -> vector<1x128xf32>
    %107 = arith.addf %97, %106 : vector<1x128xf32>
    %108 = arith.addf %107, %60 : vector<1x128xf32>
    %c0_71 = arith.constant 0 : index
    %c0_72 = arith.constant 0 : index
    %c0_73 = arith.constant 0 : index
    %109 = vector.load %arg5[%c0_71, %c0_72, %c0_73] : memref<2x1x128xf32, #tpu.memory_space<vmem>>, vector<1x1x128xf32>
    %110 = vector.shape_cast %109 : vector<1x1x128xf32> to vector<1x128xf32>
    %111 = vector.shape_cast %108 : vector<1x128xf32> to vector<1x1x128xf32>
    tpu.vector_store %arg5[%c0_71, %c0_72, %c0_73], %111 {strides = array<i32>} : memref<2x1x128xf32, #tpu.memory_space<vmem>>, vector<1x1x128xf32>,
    %112 = vector.extract_strided_slice %57 {offsets = [16, 0], sizes = [16, 128], strides = [1, 1]} : vector<32x128xf32> to vector<16x128xf32>
    %113 = tpu.transpose %112, [1, 0] : vector<16x128xf32> -> vector<128x16xf32>
    %114 = vector.extract_strided_slice %113 {offsets = [0, 0], sizes = [8, 16], strides = [1, 1]} : vector<128x16xf32> to vector<8x16xf32>
    %115 = arith.truncf %114 : vector<8x16xf32> to vector<8x16xbf16>
    %cst_74 = arith.constant dense<0.000000e+00> : vector<8x256xf32>
    %116 = tpu.matmul %115, %58, %cst_74 {dimension_numbers = #tpu.dot_dimension_numbers<[1], [0], [0], [1], [0, 0, 1, 1], [], []>} : vector<8x16xbf16>, vector<16x256xbf16>, vector<8x256xf32> -> vector<8x256xf32>
    %c1_75 = arith.constant 1 : index
    %c0_76 = arith.constant 0 : index
    %c0_77 = arith.constant 0 : index
    %117 = vector.load %arg4[%c1_75, %c0_76, %c0_77] : memref<2x8x256xf32, #tpu.memory_space<vmem>>, vector<1x8x256xf32>
    %118 = vector.shape_cast %117 : vector<1x8x256xf32> to vector<8x256xf32>
    %119 = vector.shape_cast %116 : vector<8x256xf32> to vector<1x8x256xf32>
    tpu.vector_store %arg4[%c1_75, %c0_76, %c0_77], %119 {strides = array<i32>} : memref<2x8x256xf32, #tpu.memory_space<vmem>>, vector<1x8x256xf32>,
    %120 = vector.extract_strided_slice %49 {offsets = [16, 0], sizes = [16, 128], strides = [1, 1]} : vector<32x128xf32> to vector<16x128xf32>
    %cst_78 = arith.constant dense<0.000000e+00> : vector<128xf32>
    %121 = vector.multi_reduction <add>, %120, %cst_78 [0] : vector<16x128xf32> to vector<128xf32>
    %122 = vector.shape_cast %121 : vector<128xf32> to vector<1x128xf32>
    %cst_79 = arith.constant 1.600000e+01 : f32
    %123 = vector.broadcast %cst_79 : f32 to vector<1x128xf32>
    %124 = arith.divf %122, %123 : vector<1x128xf32>
    %125 = arith.truncf %124 : vector<1x128xf32> to vector<1x128xbf16>
    %c6_80 = arith.constant 6 : index
    %c0_81 = arith.constant 0 : index
    %c0_82 = arith.constant 0 : index
    %126 = vector.load %arg1[%c6_80, %c0_81, %c0_82] : memref<10x128x128xbf16, #tpu.memory_space<vmem>>, vector<1x128x128xbf16>
    %127 = vector.shape_cast %126 : vector<1x128x128xbf16> to vector<128x128xbf16>
    %cst_83 = arith.constant dense<0.000000e+00> : vector<1x128xf32>
    %128 = tpu.matmul %125, %127, %cst_83 {dimension_numbers = #tpu.dot_dimension_numbers<[1], [0], [0], [1], [0, 0, 1, 1], [], []>} : vector<1x128xbf16>, vector<128x128xbf16>, vector<1x128xf32> -> vector<1x128xf32>
    %129 = vector.extract_strided_slice %19 {offsets = [16, 0], sizes = [16, 128], strides = [1, 1]} : vector<32x128xf32> to vector<16x128xf32>
    %cst_84 = arith.constant dense<0.000000e+00> : vector<128xf32>
    %130 = vector.multi_reduction <add>, %129, %cst_84 [0] : vector<16x128xf32> to vector<128xf32>
    %131 = vector.shape_cast %130 : vector<128xf32> to vector<1x128xf32>
    %cst_85 = arith.constant 1.600000e+01 : f32
    %132 = vector.broadcast %cst_85 : f32 to vector<1x128xf32>
    %133 = arith.divf %131, %132 : vector<1x128xf32>
    %134 = arith.truncf %133 : vector<1x128xf32> to vector<1x128xbf16>
    %c7_86 = arith.constant 7 : index
    %c0_87 = arith.constant 0 : index
    %c0_88 = arith.constant 0 : index
    %135 = vector.load %arg1[%c7_86, %c0_87, %c0_88] : memref<10x128x128xbf16, #tpu.memory_space<vmem>>, vector<1x128x128xbf16>
    %136 = vector.shape_cast %135 : vector<1x128x128xbf16> to vector<128x128xbf16>
    %cst_89 = arith.constant dense<0.000000e+00> : vector<1x128xf32>
    %137 = tpu.matmul %134, %136, %cst_89 {dimension_numbers = #tpu.dot_dimension_numbers<[1], [0], [0], [1], [0, 0, 1, 1], [], []>} : vector<1x128xbf16>, vector<128x128xbf16>, vector<1x128xf32> -> vector<1x128xf32>
    %138 = arith.addf %128, %137 : vector<1x128xf32>
    %139 = vector.extract_strided_slice %29 {offsets = [16, 0], sizes = [16, 128], strides = [1, 1]} : vector<32x128xf32> to vector<16x128xf32>
    %cst_90 = arith.constant dense<0.000000e+00> : vector<128xf32>
    %140 = vector.multi_reduction <add>, %139, %cst_90 [0] : vector<16x128xf32> to vector<128xf32>
    %141 = vector.shape_cast %140 : vector<128xf32> to vector<1x128xf32>
    %cst_91 = arith.constant 1.600000e+01 : f32
    %142 = vector.broadcast %cst_91 : f32 to vector<1x128xf32>
    %143 = arith.divf %141, %142 : vector<1x128xf32>
    %144 = arith.truncf %143 : vector<1x128xf32> to vector<1x128xbf16>
    %c8_92 = arith.constant 8 : index
    %c0_93 = arith.constant 0 : index
    %c0_94 = arith.constant 0 : index
    %145 = vector.load %arg1[%c8_92, %c0_93, %c0_94] : memref<10x128x128xbf16, #tpu.memory_space<vmem>>, vector<1x128x128xbf16>
    %146 = vector.shape_cast %145 : vector<1x128x128xbf16> to vector<128x128xbf16>
    %cst_95 = arith.constant dense<0.000000e+00> : vector<1x128xf32>
    %147 = tpu.matmul %144, %146, %cst_95 {dimension_numbers = #tpu.dot_dimension_numbers<[1], [0], [0], [1], [0, 0, 1, 1], [], []>} : vector<1x128xbf16>, vector<128x128xbf16>, vector<1x128xf32> -> vector<1x128xf32>
    %148 = arith.addf %138, %147 : vector<1x128xf32>
    %149 = vector.extract_strided_slice %39 {offsets = [16, 0], sizes = [16, 128], strides = [1, 1]} : vector<32x128xf32> to vector<16x128xf32>
    %cst_96 = arith.constant dense<0.000000e+00> : vector<128xf32>
    %150 = vector.multi_reduction <add>, %149, %cst_96 [0] : vector<16x128xf32> to vector<128xf32>
    %151 = vector.shape_cast %150 : vector<128xf32> to vector<1x128xf32>
    %cst_97 = arith.constant 1.600000e+01 : f32
    %152 = vector.broadcast %cst_97 : f32 to vector<1x128xf32>
    %153 = arith.divf %151, %152 : vector<1x128xf32>
    %154 = arith.truncf %153 : vector<1x128xf32> to vector<1x128xbf16>
    %c9_98 = arith.constant 9 : index
    %c0_99 = arith.constant 0 : index
    %c0_100 = arith.constant 0 : index
    %155 = vector.load %arg1[%c9_98, %c0_99, %c0_100] : memref<10x128x128xbf16, #tpu.memory_space<vmem>>, vector<1x128x128xbf16>
    %156 = vector.shape_cast %155 : vector<1x128x128xbf16> to vector<128x128xbf16>
    %cst_101 = arith.constant dense<0.000000e+00> : vector<1x128xf32>
    %157 = tpu.matmul %154, %156, %cst_101 {dimension_numbers = #tpu.dot_dimension_numbers<[1], [0], [0], [1], [0, 0, 1, 1], [], []>} : vector<1x128xbf16>, vector<128x128xbf16>, vector<1x128xf32> -> vector<1x128xf32>
    %158 = arith.addf %148, %157 : vector<1x128xf32>
    %159 = arith.addf %158, %60 : vector<1x128xf32>
    %c1_102 = arith.constant 1 : index
    %c0_103 = arith.constant 0 : index
    %c0_104 = arith.constant 0 : index
    %160 = vector.load %arg5[%c1_102, %c0_103, %c0_104] : memref<2x1x128xf32, #tpu.memory_space<vmem>>, vector<1x1x128xf32>
    %161 = vector.shape_cast %160 : vector<1x1x128xf32> to vector<1x128xf32>
    %162 = vector.shape_cast %159 : vector<1x128xf32> to vector<1x1x128xf32>
    tpu.vector_store %arg5[%c1_102, %c0_103, %c0_104], %162 {strides = array<i32>} : memref<2x1x128xf32, #tpu.memory_space<vmem>>, vector<1x1x128xf32>,
    return
  }
}

</mosaic_0001>

<bundles_post_ra>
// kernel: scene_parser_forward.1
= control target key start
LH: loop header
LB: loop body
LE: loop exit
PB: predicated region body
PF: predicated region fallthrough
CT: control target
= control target key end

     0   :  { %11 = vsyncpa [#allocation3], 0  ;;  %s2846_s0 = inlined_call_operand.vmem [shape: bf16[32,128], index: 0, kind: input, shape index: {}]   ;;  %s2847_s1 = inlined_call_operand.hbm [shape: bf16[10,128,128], index: 1, kind: input, shape index: {}]   ;;  %s2848_s2 = inlined_call_operand.vmem [shape: f32[7,1,128], index: 2, kind: input, shape index: {}]   ;;  %s2849_s3 = inlined_call_operand.vmem [shape: bf16[16,256], index: 3, kind: input, shape index: {}]   ;;  %s2850_s4 = inlined_call_operand.vmem [shape: f32[2,8,256], index: 4, kind: output, shape index: {0}]   ;;  %s2851_s5 = inlined_call_operand.hbm [shape: f32[2,1,128], index: 5, kind: output, shape index: {1}]  }
   0x1   :  { %12 = vsyncpa [#allocation4], 0  ;;  %s2638_s18 = smov [#allocation2]  }
   0x2   :  { %s20_s19 = sshll.u32 %s2638_s18, 4  ;;  %s21_s19 = int_to_ptr.vmem [resolvable:$true] %s20_s19 }
   0x3   :  { %s2602_s20 = scalar_lea.vmem %s21_s19, 10240  ;;  %p2607_p1 = scmp.lt.s32.totalorder %s21_s19, %s21_s19 }
   0x4   :  { %p2603_p0 = scmp.ne.s32.totalorder %s21_s19, %s2602_s20  ;;  %p2608_p2 = scmp.lt.s32.totalorder %s2602_s20, %s2602_s20 }
   0x6   :  { %p2609_p3 = por %p2608_p2, %p2607_p1 }
   0x8   :  { %p2610_p4 = pnand %p2609_p3, %p2603_p0 }
   0xa   :  { %2613 = shalt.err (!%p2610_p4)
}
   0xb   :  { %s2639_s21 = smov 64   ;;  %s2640_s22 = smov 4  }
   0xc   :  { %26 = dma.hbm_to_vmem [thread:$0]  %s2847_s1, 10240, %s21_s19, [#allocation3], %s2639_s21, %s2639_s21, %s2640_s22  }
   0xd   :  { %2634 = dma.done.wait [#allocation3], 10240  }
   0xe   :  { %2635 = vsyncadd [#allocation3], 4294957056  ;;  %v2477_v0 = vld [vmem:[#allocation2 + $0x38] sm:$0xff]   ;;  %v2478_v1 = vld [vmem:[#allocation2 + $0x30] sm:$0xff]   ;;  %vm2642_vm0 = vmmov 0   ;;  %vm858_vm1 = vcmask 130048  }
   0xf   :  { %2188 = vmatprep.subr.bf16.mxu0 %v2477_v0  ;;  %v2479_v2 = vld [vmem:[#allocation2 + $0x28] sm:$0xff]   ;;  %v2480_v3 = vld [vmem:[#allocation2 + $0x20] sm:$0xff]   ;;  %v2487_v5 = vld [vmem:[#allocation2 + $0x78] sm:$0xff]  }
  0x10   :  { %2189 = vmatpush3.bf16.msra.mxu0 %v2477_v0  ;;  %v2485_v4 = vld [vmem:[%s2846_s0] sm:$0xff]   ;;  %v2488_v6 = vld [vmem:[#allocation2 + $0x70] sm:$0xff]   ;;  %v2481_v7 = vld [vmem:[#allocation2 + $0x18] sm:$0xff]   ;;  %2208 = vmatprep.subr.bf16.mxu1 %v2487_v5 }
  0x11   :  { %2190 = vmatprep.subr.bf16.mxu0 %v2478_v1  ;;  %2204 = vmatprep.mubr.bf16.mxu0 %v2485_v4  ;;  %v2482_v8 = vld [vmem:[#allocation2 + $0x10] sm:$0xff]   ;;  %v2489_v9 = vld [vmem:[#allocation2 + $0x68] sm:$0xff]   ;;  %v2490_v10 = vld [vmem:[#allocation2 + $0x60] sm:$0xff]  }
  0x12   :  { %2209 = vmatpush3.bf16.msra.mxu1 %v2487_v5  ;;  %v2483_v11 = vld [vmem:[#allocation2 + $0x8] sm:$0xff]   ;;  %v2491_v12 = vld [vmem:[#allocation2 + $0x58] sm:$0xff]   ;;  %v2484_v13 = vld [vmem:[#allocation2] sm:$0xff]  }
  0x13   :  { %2210 = vmatprep.subr.bf16.mxu1 %v2488_v6  ;;  %v2486_v14 = vld [vmem:[%s2846_s0 + $0x8] sm:$0xff]   ;;  %v2492_v15 = vld [vmem:[#allocation2 + $0x50] sm:$0xff]   ;;  %v2494_v17 = vld [vmem:[#allocation2 + $0x40] sm:$0xff]  }
  0x14   :  { %2191 = vmatpush3.bf16.msra.mxu0 %v2478_v1  ;;  %v2493_v16 = vld [vmem:[#allocation2 + $0x48] sm:$0xff]   ;;  %v2495_v18 = vld [vmem:[#allocation2 + $0xb8] sm:$0xff]   ;;  %v2496_v19 = vld [vmem:[#allocation2 + $0xb0] sm:$0xff]  }
  0x15   :  { %2192 = vmatprep.subr.bf16.mxu0 %v2479_v2  ;;  %v2497_v20 = vld [vmem:[#allocation2 + $0xa8] sm:$0xff]   ;;  %v2498_v21 = vld [vmem:[#allocation2 + $0xa0] sm:$0xff]   ;;  %v2499_v22 = vld [vmem:[#allocation2 + $0x98] sm:$0xff]  }
  0x16   :  { %2211 = vmatpush3.bf16.msra.mxu1 %v2488_v6  ;;  %v1924_v25 = vld [vmem:[%s2848_s2] ss:$0 sm:$0xff]  ;;  %v2500_v38 = vld [vmem:[#allocation2 + $0x90] sm:$0xff]   ;;  %v2501_v39 = vld [vmem:[#allocation2 + $0x88] sm:$0xff]  }
  0x17   :  { %2212 = vmatprep.subr.bf16.mxu1 %v2489_v9  ;;  %v2502_v40 = vld [vmem:[#allocation2 + $0x80] sm:$0xff]   ;;  %v2503_v41 = vld [vmem:[#allocation2 + $0xf8] sm:$0xff]   ;;  %v2504_v42 = vld [vmem:[#allocation2 + $0xf0] sm:$0xff]  }
  0x18   :  { %2193 = vmatpush3.bf16.msra.mxu0 %v2479_v2  ;;  %v2505_v43 = vld [vmem:[#allocation2 + $0xe8] sm:$0xff]   ;;  %v2506_v44 = vld [vmem:[#allocation2 + $0xe0] sm:$0xff]   ;;  %v2507_v45 = vld [vmem:[#allocation2 + $0xd8] sm:$0xff]  }
  0x19   :  { %2194 = vmatprep.subr.bf16.mxu0 %v2480_v3  ;;  %v1936_v47 = vld [vmem:[%s2848_s2 + $0x1] ss:$0 sm:$0xff]  ;;  %v2508_v63 = vld [vmem:[#allocation2 + $0xd0] sm:$0xff]   ;;  %v2509_v0 = vld [vmem:[#allocation2 + $0xc8] sm:$0xff]  }
  0x1a   :  { %2213 = vmatpush3.bf16.msra.mxu1 %v2489_v9  ;;  %v2510_v1 = vld [vmem:[#allocation2 + $0xc0] sm:$0xff]   ;;  %v2511_v2 = vld [vmem:[#allocation2 + $0x138] sm:$0xff]   ;;  %v2513_v4 = vld [vmem:[#allocation2 + $0x128] sm:$0xff]  }
  0x1b   :  { %2214 = vmatprep.subr.bf16.mxu1 %v2490_v10  ;;  %v2514_v5 = vld [vmem:[#allocation2 + $0x120] sm:$0xff]   ;;  %v2515_v6 = vld [vmem:[#allocation2 + $0x118] sm:$0xff]  }
  0x1c   :  { %2195 = vmatpush3.bf16.msra.mxu0 %v2480_v3  ;;  %v2512_v3 = vld [vmem:[#allocation2 + $0x130] sm:$0xff]  }
  0x1d   :  { %2196 = vmatprep.subr.bf16.mxu0 %v2481_v7 }
  0x1e   :  { %2215 = vmatpush3.bf16.msra.mxu1 %v2490_v10 }
  0x1f   :  { %2216 = vmatprep.subr.bf16.mxu1 %v2491_v12 }
  0x20   :  { %2197 = vmatpush3.bf16.msra.mxu0 %v2481_v7 }
  0x21   :  { %2198 = vmatprep.subr.bf16.mxu0 %v2482_v8 }
  0x22   :  { %2217 = vmatpush3.bf16.msra.mxu1 %v2491_v12 }
  0x23   :  { %2218 = vmatprep.subr.bf16.mxu1 %v2492_v15 }
  0x24   :  { %2199 = vmatpush3.bf16.msra.mxu0 %v2482_v8  ;;  %v1946_v8 = vld [vmem:[%s2848_s2 + $0x2] ss:$0 sm:$0xff] }
  0x25   :  { %2200 = vmatprep.subr.bf16.mxu0 %v2483_v11 }
  0x26   :  { %2219 = vmatpush3.bf16.msra.mxu1 %v2492_v15 }
  0x27   :  { %2220 = vmatprep.subr.bf16.mxu1 %v2493_v16 }
  0x28   :  { %2201 = vmatpush3.bf16.msra.mxu0 %v2483_v11 }
  0x29   :  { %2202 = vmatprep.subr.bf16.mxu0 %v2484_v13 }
  0x2a   :  { %2221 = vmatpush3.bf16.msra.mxu1 %v2493_v16 }
  0x2b   :  { %2222 = vmatprep.subr.bf16.mxu1 %v2494_v17 }
  0x2c   :  { %2203 = vmatpush3.bf16.msra.mxu0 %v2484_v13 }
  0x2d   :  { %2228 = vmatprep.subr.bf16.mxu0 %v2495_v18 }
  0x2e   :  { %2223 = vmatpush3.bf16.msra.mxu1 %v2494_v17 }
  0x2f   :  { %2205 = vmatmul.mubr.bf16.vlgmr.msra.gmra.mxu0 %v2486_v14  ;;  %2248 = vmatprep.subr.bf16.mxu1 %v2503_v41 }
  0x30   :  { %2229 = vmatpush3.bf16.msra.mxu0 %v2495_v18 }
  0x31   :  { %2230 = vmatprep.subr.bf16.mxu0 %v2496_v19 }
  0x34   :  { %2231 = vmatpush3.bf16.msra.mxu0 %v2496_v19 }
  0x35   :  { %2232 = vmatprep.subr.bf16.mxu0 %v2497_v20 }
  0x38   :  { %2233 = vmatpush3.bf16.msra.mxu0 %v2497_v20 }
  0x39   :  { %2234 = vmatprep.subr.bf16.mxu0 %v2498_v21 }
  0x3c   :  { %2235 = vmatpush3.bf16.msra.mxu0 %v2498_v21 }
  0x3d   :  { %2236 = vmatprep.subr.bf16.mxu0 %v2499_v22 }
  0x40   :  { %2237 = vmatpush3.bf16.msra.mxu0 %v2499_v22 }
  0x41   :  { %2238 = vmatprep.subr.bf16.mxu0 %v2500_v38 }
  0x44   :  { %2239 = vmatpush3.bf16.msra.mxu0 %v2500_v38 }
  0x45   :  { %2240 = vmatprep.subr.bf16.mxu0 %v2501_v39 }
  0x48   :  { %2241 = vmatpush3.bf16.msra.mxu0 %v2501_v39 }
  0x49   :  { %2242 = vmatprep.subr.bf16.mxu0 %v2502_v40 }
  0x4c   :  { %2243 = vmatpush3.bf16.msra.mxu0 %v2502_v40 }
  0x4d   :  { %2268 = vmatprep.subr.bf16.mxu0 %v2511_v2 }
  0xef   :  { %v2206_v23 = vpop.f32.mrf.mxu0 }
  0xf0   :  { %v165_v29 = vadd.f32 %v2206_v23, %v1924_v25 }
  0xf1   :  { %v156_v24 = vpop.f32.mrf.mxu0 }
  0xf2   :  { %v157_v27 = vadd.f32 %v1924_v25, %v156_v24  ;;  %v173_v35 = vmax.f32 %v165_v29, 0.0  ;;  %v2516_v24 = vld [vmem:[#allocation2 + $0x110] sm:$0xff]   ;;  %v2521_v29 = vld [vmem:[#allocation2 + $0x168] sm:$0xff]  }
  0xf3   :  { %v2207_v26 = vpop.f32.mrf.mxu0 }
  0xf4   :  { %v168_v28 = vadd.f32 %v2207_v26, %v1924_v25  ;;  %v171_v33 = vmax.f32 %v157_v27, 0.0  ;;  %v2518_v26 = vld [vmem:[#allocation2 + $0x100] sm:$0xff]   ;;  %v2519_v27 = vld [vmem:[#allocation2 + $0x178] sm:$0xff]  }
  0xf5   :  { %v159_v30 = vpop.f32.mrf.mxu0 }
  0xf6   :  { %v160_v31 = vadd.f32 %v1924_v25, %v159_v30  ;;  %v174_v32 = vmax.f32 %v168_v28, 0.0  ;;  %v2517_v25 = vld [vmem:[#allocation2 + $0x108] sm:$0xff]   ;;  %v2520_v28 = vld [vmem:[#allocation2 + $0x170] sm:$0xff]   ;;  %v2522_v30 = vld [vmem:[#allocation2 + $0x160] sm:$0xff]  }
  0xf8   :  { %v172_v34 = vmax.f32 %v160_v31, 0.0  ;;  %v176_v37 = vpack.c.bf16 %v174_v32, %v173_v35  ;;  %v2523_v31 = vld [vmem:[#allocation2 + $0x158] sm:$0xff]  }
  0xfa   :  { %v175_v36 = vpack.c.bf16 %v172_v34, %v171_v33  ;;  %v1956_v33 = vld [vmem:[%s2848_s2 + $0x3] ss:$0 sm:$0xff] }
  0xfc   :  { %2224 = vmatprep.mubr.bf16.mxu1 %v175_v36 }
  0xfd   :  { %2225 = vmatmul.mubr.bf16.vlgmr.msra.gmra.mxu1 %v176_v37 }
  0xfe   :  { %2249 = vmatpush3.bf16.msra.mxu1 %v2503_v41 }
  0xff   :  { %2250 = vmatprep.subr.bf16.mxu1 %v2504_v42 }
 0x102   :  { %2251 = vmatpush3.bf16.msra.mxu1 %v2504_v42 }
 0x103   :  { %2252 = vmatprep.subr.bf16.mxu1 %v2505_v43 }
 0x106   :  { %2253 = vmatpush3.bf16.msra.mxu1 %v2505_v43 }
 0x107   :  { %2254 = vmatprep.subr.bf16.mxu1 %v2506_v44 }
 0x10a   :  { %2255 = vmatpush3.bf16.msra.mxu1 %v2506_v44 }
 0x10b   :  { %2256 = vmatprep.subr.bf16.mxu1 %v2507_v45 }
 0x10e   :  { %2257 = vmatpush3.bf16.msra.mxu1 %v2507_v45 }
 0x10f   :  { %2258 = vmatprep.subr.bf16.mxu1 %v2508_v63 }
 0x112   :  { %2259 = vmatpush3.bf16.msra.mxu1 %v2508_v63 }
 0x113   :  { %2260 = vmatprep.subr.bf16.mxu1 %v2509_v0 }
 0x116   :  { %2261 = vmatpush3.bf16.msra.mxu1 %v2509_v0 }
 0x117   :  { %2262 = vmatprep.subr.bf16.mxu1 %v2510_v1 }
 0x11a   :  { %2263 = vmatpush3.bf16.msra.mxu1 %v2510_v1 }
 0x11b   :  { %2288 = vmatprep.subr.bf16.mxu1 %v2519_v27 }
 0x1bd   :  { %v2226_v46 = vpop.f32.mrf.mxu1 }
 0x1be   :  { %v293_v49 = vadd.f32 %v2226_v46, %v1936_v47 }
 0x1bf   :  { %v284_v48 = vpop.f32.mrf.mxu1 }
 0x1c0   :  { %v285_v51 = vadd.f32 %v1936_v47, %v284_v48  ;;  %v301_v54 = vmax.f32 %v293_v49, 0.0  ;;  %v2524_v49 = vld [vmem:[#allocation2 + $0x150] sm:$0xff]  }
 0x1c1   :  { %v2227_v50 = vpop.f32.mrf.mxu1 }
 0x1c2   :  { %v296_v52 = vadd.f32 %v2227_v50, %v1936_v47  ;;  %v299_v57 = vmax.f32 %v285_v51, 0.0  ;;  %v2525_v50 = vld [vmem:[#allocation2 + $0x148] sm:$0xff]   ;;  %v2526_v51 = vld [vmem:[#allocation2 + $0x140] sm:$0xff]  }
 0x1c3   :  { %v287_v53 = vpop.f32.mrf.mxu1 }
 0x1c4   :  { %v302_v55 = vmax.f32 %v296_v52, 0.0  ;;  %v288_v56 = vadd.f32 %v1936_v47, %v287_v53  ;;  %v2641_v52 = vmov 0.0  }
 0x1c6   :  { %v2692_v58 = vadd.f32 %v302_v55, %v301_v54  ;;  %v300_v59 = vmax.f32 %v288_v56, 0.0  ;;  %v304_v62 = vpack.c.bf16 %v302_v55, %v301_v54  ;;  %v1966_v54 = vld [vmem:[%s2848_s2 + $0x4] ss:$0 sm:$0xff] }
 0x1c8   :  { %v303_v60 = vpack.c.bf16 %v300_v59, %v299_v57  ;;  %v2694_v61 = vadd.f32 %v300_v59, %v299_v57 }
 0x1ca   :  { %2244 = vmatprep.mubr.bf16.mxu0 %v303_v60 }
 0x1cb   :  { %2245 = vmatmul.mubr.bf16.vlgmr.msra.gmra.mxu0 %v304_v62 }
 0x1cc   :  { %2269 = vmatpush3.bf16.msra.mxu0 %v2511_v2 }
 0x1cd   :  { %2270 = vmatprep.subr.bf16.mxu0 %v2512_v3 }
 0x1d0   :  { %2271 = vmatpush3.bf16.msra.mxu0 %v2512_v3 }
 0x1d1   :  { %2272 = vmatprep.subr.bf16.mxu0 %v2513_v4 }
 0x1d4   :  { %2273 = vmatpush3.bf16.msra.mxu0 %v2513_v4 }
 0x1d5   :  { %2274 = vmatprep.subr.bf16.mxu0 %v2514_v5 }
 0x1d8   :  { %2275 = vmatpush3.bf16.msra.mxu0 %v2514_v5 }
 0x1d9   :  { %2276 = vmatprep.subr.bf16.mxu0 %v2515_v6 }
 0x1dc   :  { %2277 = vmatpush3.bf16.msra.mxu0 %v2515_v6 }
 0x1dd   :  { %2278 = vmatprep.subr.bf16.mxu0 %v2516_v24 }
 0x1e0   :  { %2279 = vmatpush3.bf16.msra.mxu0 %v2516_v24  ;;  %v2535_v24 = vld [vmem:[#allocation2 + $0x238] sm:$0xff]  }
 0x1e1   :  { %2280 = vmatprep.subr.bf16.mxu0 %v2517_v25 }
 0x1e4   :  { %2281 = vmatpush3.bf16.msra.mxu0 %v2517_v25 }
 0x1e5   :  { %2282 = vmatprep.subr.bf16.mxu0 %v2518_v26 }
 0x1e8   :  { %2283 = vmatpush3.bf16.msra.mxu0 %v2518_v26  ;;  %v2536_v26 = vld [vmem:[#allocation2 + $0x230] sm:$0xff]  }
 0x28b   :  { %v2246_v7 = vpop.f32.mrf.mxu0 }
 0x28c   :  { %v421_v10 = vadd.f32 %v2246_v7, %v1946_v8  ;;  %v2527_v7 = vld [vmem:[#allocation2 + $0x1f8] sm:$0xff]  }
 0x28d   :  { %v412_v9 = vpop.f32.mrf.mxu0 }
 0x28e   :  { %v413_v12 = vadd.f32 %v1946_v8, %v412_v9  ;;  %v429_v15 = vmax.f32 %v421_v10, 0.0  ;;  %v2528_v9 = vld [vmem:[#allocation2 + $0x1f0] sm:$0xff]   ;;  %v933_v10 = vrot.slane %v2694_v61, 4 }
 0x28f   :  { %v2247_v11 = vpop.f32.mrf.mxu0 }
 0x290   :  { %v424_v13 = vadd.f32 %v2247_v11, %v1946_v8  ;;  %v427_v18 = vmax.f32 %v413_v12, 0.0  ;;  %v2529_v11 = vld [vmem:[#allocation2 + $0x1e8] sm:$0xff]   ;;  %v934_v12 = vadd.f32 %v933_v10, %v2694_v61 }
 0x291   :  { %v415_v14 = vpop.f32.mrf.mxu0 }
 0x292   :  { %v430_v16 = vmax.f32 %v424_v13, 0.0  ;;  %v416_v17 = vadd.f32 %v1946_v8, %v415_v14  ;;  %v2530_v13 = vld [vmem:[#allocation2 + $0x1e0] sm:$0xff]   ;;  %v935_v14 = vrot.slane %v934_v12, 2 }
 0x294   :  { %v2699_v19 = vadd.f32 %v430_v16, %v429_v15  ;;  %v428_v20 = vmax.f32 %v416_v17, 0.0  ;;  %v432_v23 = vpack.c.bf16 %v430_v16, %v429_v15  ;;  %v2531_v15 = vld [vmem:[#allocation2 + $0x1d8] sm:$0xff]   ;;  %v936_v16 = vadd.f32 %v935_v14, %v934_v12  ;;  %v2532_v17 = vld [vmem:[#allocation2 + $0x1d0] sm:$0xff]  }
 0x296   :  { %v431_v21 = vpack.c.bf16 %v428_v20, %v427_v18  ;;  %v2701_v22 = vadd.f32 %v428_v20, %v427_v18  ;;  %v937_v18 = vrot.slane %v936_v16, 1  ;;  %v2533_v20 = vld [vmem:[#allocation2 + $0x1c8] sm:$0xff]  }
 0x298   :  { %2264 = vmatprep.mubr.bf16.mxu1 %v431_v21  ;;  %v938_v61 = vadd.f32 %v937_v18, %v936_v16  ;;  %v2534_v21 = vld [vmem:[#allocation2 + $0x1c0] sm:$0xff]  }
 0x299   :  { %2265 = vmatmul.mubr.bf16.vlgmr.msra.gmra.mxu1 %v432_v23 }
 0x29a   :  { %2289 = vmatpush3.bf16.msra.mxu1 %v2519_v27  ;;  %v939_v23 = vmul.f32 0.0625, %v938_v61  ;;  %v1135_v27 = vrot.slane %v2701_v22, 4 }
 0x29b   :  { %2290 = vmatprep.subr.bf16.mxu1 %v2520_v28 }
 0x29c   :  { %v940_v25 = vpack.c.bf16 %v939_v23, %v939_v23  ;;  %v2555_v23 = vld [vmem:[#allocation2 + $0x198] sm:$0xff]  }
 0x29e   :  { %2291 = vmatpush3.bf16.msra.mxu1 %v2520_v28  ;;  %v2537_v28 = vld [vmem:[#allocation2 + $0x228] sm:$0xff]  }
 0x29f   :  { %2292 = vmatprep.subr.bf16.mxu1 %v2521_v29 }
 0x2a2   :  { %2293 = vmatpush3.bf16.msra.mxu1 %v2521_v29  ;;  %v1136_v29 = vadd.f32 %v1135_v27, %v2701_v22 }
 0x2a3   :  { %2294 = vmatprep.subr.bf16.mxu1 %v2522_v30 }
 0x2a6   :  { %2295 = vmatpush3.bf16.msra.mxu1 %v2522_v30  ;;  %v2538_v30 = vld [vmem:[#allocation2 + $0x220] sm:$0xff]  }
 0x2a7   :  { %2296 = vmatprep.subr.bf16.mxu1 %v2523_v31 }
 0x2aa   :  { %2297 = vmatpush3.bf16.msra.mxu1 %v2523_v31  ;;  %v1137_v31 = vrot.slane %v1136_v29, 2 }
 0x2ab   :  { %2298 = vmatprep.subr.bf16.mxu1 %v2524_v49 }
 0x2ae   :  { %2299 = vmatpush3.bf16.msra.mxu1 %v2524_v49 }
 0x2af   :  { %2300 = vmatprep.subr.bf16.mxu1 %v2525_v50 }
 0x2b2   :  { %2301 = vmatpush3.bf16.msra.mxu1 %v2525_v50 }
 0x2b3   :  { %2302 = vmatprep.subr.bf16.mxu1 %v2526_v51 }
 0x2b6   :  { %2303 = vmatpush3.bf16.msra.mxu1 %v2526_v51 }
 0x2b7   :  { %2308 = vmatprep.subr.bf16.mxu1 %v2641_v52 }
 0x359   :  { %v2266_v32 = vpop.f32.mrf.mxu1 }
 0x35a   :  { %v549_v35 = vadd.f32 %v2266_v32, %v1956_v33  ;;  %v2539_v32 = vld [vmem:[#allocation2 + $0x218] sm:$0xff]  }
 0x35b   :  { %v540_v34 = vpop.f32.mrf.mxu1 }
 0x35c   :  { %v541_v37 = vadd.f32 %v1956_v33, %v540_v34  ;;  %v557_v40 = vmax.f32 %v549_v35, 0.0  ;;  %v2540_v34 = vld [vmem:[#allocation2 + $0x210] sm:$0xff]  }
 0x35d   :  { %v2267_v36 = vpop.f32.mrf.mxu1 }
 0x35e   :  { %v552_v38 = vadd.f32 %v2267_v36, %v1956_v33  ;;  %v555_v43 = vmax.f32 %v541_v37, 0.0  ;;  %v2541_v36 = vld [vmem:[#allocation2 + $0x208] sm:$0xff]   ;;  %v2542_v37 = vld [vmem:[#allocation2 + $0x200] sm:$0xff]  }
 0x35f   :  { %v543_v39 = vpop.f32.mrf.mxu1 }
 0x360   :  { %v558_v41 = vmax.f32 %v552_v38, 0.0  ;;  %v544_v42 = vadd.f32 %v1956_v33, %v543_v39  ;;  %v1138_v33 = vadd.f32 %v1137_v31, %v1136_v29 }
 0x362   :  { %v2706_v44 = vadd.f32 %v558_v41, %v557_v40  ;;  %v556_v45 = vmax.f32 %v544_v42, 0.0  ;;  %v560_v48 = vpack.c.bf16 %v558_v41, %v557_v40  ;;  %v1139_v35 = vrot.slane %v1138_v33, 1  ;;  %v2543_v40 = vld [vmem:[%s2849_s3] ss:$8 sps:$4 sm:$0xff]   ;;  %v2545_v41 = vld [vmem:[%s2849_s3 + $0x4] ss:$8 sps:$4 sm:$0xff]  }
 0x363   :  { %876 = vmatprep.subr.bf16.mxu0 %v2545_v41  ;;  %v1976_v42 = vld [vmem:[%s2848_s2 + $0x5] ss:$0 sm:$0xff] }
 0x364   :  { %v559_v46 = vpack.c.bf16 %v556_v45, %v555_v43  ;;  %v2708_v47 = vadd.f32 %v556_v45, %v555_v43  ;;  %v1140_v22 = vadd.f32 %v1139_v35, %v1138_v33 }
 0x366   :  { %2284 = vmatprep.mubr.bf16.mxu0 %v559_v46  ;;  %v1141_v38 = vmul.f32 0.0625, %v1140_v22  ;;  %v2643_v46 = vmov 0  }
 0x367   :  { %2285 = vmatmul.mubr.bf16.vlgmr.msra.gmra.mxu0 %v560_v48 }
 0x368   :  { %v1142_v39 = vpack.c.bf16 %v1141_v38, %v1141_v38  ;;  %877 = vmatpush1.bf16.msra.mxu0 %v2543_v40  ;;  %894 = vmatprep.mubr.bf16.mxu0 %v2643_v46 }
 0x369   :  { %2328 = vmatprep.subr.bf16.mxu0 %v2641_v52 }
 0x427   :  { %v2286_v53 = vpop.f32.mrf.mxu0 }
 0x428   :  { %v677_v56 = vadd.f32 %v2286_v53, %v1966_v54 }
 0x429   :  { %v668_v55 = vpop.f32.mrf.mxu0 }
 0x42a   :  { %v669_v59 = vadd.f32 %v1966_v54, %v668_v55  ;;  %v685_v63 = vmax.f32 %v677_v56, 0.0 }
 0x42b   :  { %v2287_v57 = vpop.f32.mrf.mxu0 }
 0x42c   :  { %v680_v60 = vadd.f32 %v2287_v57, %v1966_v54  ;;  %v683_v2 = vmax.f32 %v669_v59, 0.0 }
 0x42d   :  { %v671_v62 = vpop.f32.mrf.mxu0 }
 0x42e   :  { %v686_v0 = vmax.f32 %v680_v60, 0.0  ;;  %v672_v1 = vadd.f32 %v1966_v54, %v671_v62 }
 0x430   :  { %v2714_v3 = vadd.f32 %v686_v0, %v685_v63  ;;  %v684_v4 = vmax.f32 %v672_v1, 0.0  ;;  %v688_v8 = vpack.c.bf16 %v686_v0, %v685_v63 }
 0x432   :  { %v687_v5 = vpack.c.bf16 %v684_v4, %v683_v2  ;;  %v2716_v6 = vadd.f32 %v684_v4, %v683_v2  ;;  %v2546_v2 = vld [vmem:[#allocation2 + $0x1b8] sm:$0xff]   ;;  %v1447_v10 = vrot.slane %v2714_v3, 4 }
 0x434   :  { %2304 = vmatprep.mubr.bf16.mxu1 %v687_v5  ;;  %v906_v12 = vrot.slane %v2716_v6, 4  ;;  %v1448_v14 = vadd.f32 %v1447_v10, %v2714_v3  ;;  %v2554_v3 = vld [vmem:[#allocation2 + $0x198] sm:$0xff]  }
 0x435   :  { %2305 = vmatmul.mubr.bf16.vlgmr.msra.gmra.mxu1 %v688_v8 }
 0x436   :  { %2309 = vmatpush3.bf16.msra.mxu1 %v2527_v7  ;;  %2324 = vmatprep.mubr.msk.bf16.mxu1 %vm2642_vm0, %v2641_v52  ;;  %v2547_v7 = vld [vmem:[#allocation2 + $0x1b8] sm:$0xff]   ;;  %v907_v16 = vadd.f32 %v906_v12, %v2716_v6  ;;  %v1449_v18 = vrot.slane %v1448_v14, 2 }
 0x437   :  { %2310 = vmatprep.subr.bf16.mxu1 %v2641_v52 }
 0x438   :  { %v908_v61 = vrot.slane %v907_v16, 2 }
 0x43a   :  { %2311 = vmatpush3.bf16.msra.mxu1 %v2528_v9  ;;  %v2548_v9 = vld [vmem:[#allocation2 + $0x1b0] sm:$0xff]   ;;  %v909_v6 = vadd.f32 %v908_v61, %v907_v16 }
 0x43b   :  { %2312 = vmatprep.subr.bf16.mxu1 %v2641_v52 }
 0x43c   :  { %v910_v27 = vrot.slane %v909_v6, 1 }
 0x43e   :  { %2313 = vmatpush3.bf16.msra.mxu1 %v2529_v11  ;;  %v2549_v11 = vld [vmem:[#allocation2 + $0x1b0] sm:$0xff]   ;;  %v911_v31 = vadd.f32 %v910_v27, %v909_v6  ;;  %v2585_v6 = vld [vmem:[#allocation2 + $0x1c0] sm:$0xff]  }
 0x43f   :  { %2314 = vmatprep.subr.bf16.mxu1 %v2641_v52  ;;  %v2587_v27 = vld [vmem:[#allocation2 + $0x230] sm:$0xff]  }
 0x440   :  { %v913_v35 = vmul.f32 0.0625, %v911_v31  ;;  %v2589_v31 = vld [vmem:[#allocation2 + $0x220] sm:$0xff]  }
 0x442   :  { %2315 = vmatpush3.bf16.msra.mxu1 %v2530_v13  ;;  %v2550_v13 = vld [vmem:[#allocation2 + $0x1a8] sm:$0xff]   ;;  %v914_v38 = vpack.c.bf16 %v913_v35, %v913_v35  ;;  %v2591_v35 = vld [vmem:[#allocation2 + $0x210] sm:$0xff]  }
 0x443   :  { %2316 = vmatprep.subr.bf16.mxu1 %v2641_v52 }
 0x446   :  { %2317 = vmatpush3.bf16.msra.mxu1 %v2531_v15  ;;  %v2551_v15 = vld [vmem:[#allocation2 + $0x1a8] sm:$0xff]  }
 0x447   :  { %2318 = vmatprep.subr.bf16.mxu1 %v2641_v52 }
 0x44a   :  { %2319 = vmatpush3.bf16.msra.mxu1 %v2532_v17  ;;  %v2552_v17 = vld [vmem:[#allocation2 + $0x1a0] sm:$0xff]  }
 0x44b   :  { %2320 = vmatprep.subr.bf16.mxu1 %v2641_v52 }
 0x44e   :  { %2321 = vmatpush3.bf16.msra.mxu1 %v2533_v20  ;;  %v2553_v20 = vld [vmem:[#allocation2 + $0x1a0] sm:$0xff]  }
 0x44f   :  { %2322 = vmatprep.subr.bf16.mxu1 %v2641_v52 }
 0x452   :  { %2323 = vmatpush3.bf16.msra.mxu1 %v2534_v21  ;;  %v1450_v21 = vadd.f32 %v1449_v18, %v1448_v14  ;;  %v1472_v14 = vrot.slane %v2692_v58, 4 }
 0x453   :  { %2348 = vmatprep.subr.bf16.mxu1 %v2641_v52 }
 0x454   :  { %v1473_v16 = vadd.f32 %v1472_v14, %v2692_v58 }
 0x455   :  { %2325 = vmatmul.mubr.bf16.vlgmr.msra.gmra.mxu1 %v940_v25  ;;  %v1451_v25 = vrot.slane %v1450_v21, 1 }
 0x456   :  { %2349 = vmatpush3.bf16.msra.mxu1 %v2535_v24  ;;  %2364 = vmatprep.mubr.msk.bf16.mxu1 %vm2642_vm0, %v2641_v52  ;;  %v2556_v24 = vld [vmem:[#allocation2 + $0x190] sm:$0xff]   ;;  %v1474_v18 = vrot.slane %v1473_v16, 2 }
 0x457   :  { %2350 = vmatprep.subr.bf16.mxu1 %v2641_v52  ;;  %v1452_v29 = vadd.f32 %v1451_v25, %v1450_v21  ;;  %v2586_v25 = vld [vmem:[#allocation2 + $0x238] sm:$0xff]  }
 0x458   :  { %v1475_v61 = vadd.f32 %v1474_v18, %v1473_v16 }
 0x459   :  { %v1453_v33 = vmul.f32 0.0625, %v1452_v29  ;;  %v2588_v29 = vld [vmem:[#allocation2 + $0x228] sm:$0xff]  }
 0x45a   :  { %2351 = vmatpush3.bf16.msra.mxu1 %v2536_v26  ;;  %v2557_v26 = vld [vmem:[#allocation2 + $0x190] sm:$0xff]   ;;  %v1476_v21 = vrot.slane %v1475_v61, 1 }
 0x45b   :  { %2352 = vmatprep.subr.bf16.mxu1 %v2641_v52  ;;  %v1454_v22 = vpack.c.bf16 %v1453_v33, %v1453_v33  ;;  %v2590_v33 = vld [vmem:[#allocation2 + $0x218] sm:$0xff]  }
 0x45c   :  { %v1477_v58 = vadd.f32 %v1476_v21, %v1475_v61 }
 0x45e   :  { %2353 = vmatpush3.bf16.msra.mxu1 %v2537_v28  ;;  %v2558_v28 = vld [vmem:[#allocation2 + $0x188] sm:$0xff]  }
 0x45f   :  { %2354 = vmatprep.subr.bf16.mxu1 %v2641_v52 }
 0x462   :  { %2355 = vmatpush3.bf16.msra.mxu1 %v2538_v30  ;;  %v2559_v30 = vld [vmem:[#allocation2 + $0x188] sm:$0xff]  }
 0x463   :  { %2356 = vmatprep.subr.bf16.mxu1 %v2641_v52 }
 0x466   :  { %2357 = vmatpush3.bf16.msra.mxu1 %v2539_v32  ;;  %v2560_v32 = vld [vmem:[#allocation2 + $0x180] sm:$0xff]  }
 0x467   :  { %2358 = vmatprep.subr.bf16.mxu1 %v2641_v52 }
 0x46a   :  { %2359 = vmatpush3.bf16.msra.mxu1 %v2540_v34  ;;  %v2561_v34 = vld [vmem:[#allocation2 + $0x180] sm:$0xff]  }
 0x46b   :  { %2360 = vmatprep.subr.bf16.mxu1 %v2641_v52 }
 0x46e   :  { %2361 = vmatpush3.bf16.msra.mxu1 %v2541_v36  ;;  %v2562_v36 = vld [vmem:[#allocation2 + $0x278] sm:$0xff]  }
 0x46f   :  { %2362 = vmatprep.subr.bf16.mxu1 %v2641_v52 }
 0x472   :  { %2363 = vmatpush3.bf16.msra.mxu1 %v2542_v37  ;;  %v2563_v37 = vld [vmem:[#allocation2 + $0x278] sm:$0xff]  }
 0x473   :  { %1416 = vmatprep.subr.bf16.mxu1 %v2545_v41  ;;  %v2565_v41 = vld [vmem:[#allocation2 + $0x270] sm:$0xff]  }
 0x475   :  { %2365 = vmatmul.mubr.bf16.vlgmr.msra.gmra.mxu1 %v1142_v39  ;;  %v2564_v39 = vld [vmem:[#allocation2 + $0x270] sm:$0xff]  }
 0x476   :  { %1417 = vmatpush1.bf16.msra.mxu1 %v2543_v40  ;;  %1434 = vmatprep.mubr.bf16.mxu1 %v2643_v46  ;;  %v1787_v40 = vrot.slane %v2706_v44, 4  ;;  %v2567_v46 = vld [vmem:[#allocation2 + $0x268] sm:$0xff]  }
 0x477   :  { %2408 = vmatprep.subr.bf16.mxu1 %v2641_v52 }
 0x4f5   :  { %v2306_v43 = vpop.f32.mrf.mxu1 }
 0x4f6   :  { %v805_v45 = vadd.f32 %v2306_v43, %v1976_v42  ;;  %v2566_v43 = vld [vmem:[#allocation2 + $0x268] sm:$0xff]  }
 0x4f7   :  { %v796_v48 = vpop.f32.mrf.mxu1 }
 0x4f8   :  { %1366 = vxpose.xlu1.b32.start [1/2] (short) (narrow) %v805_v45, 8  ;;  %v797_v49 = vadd.f32 %v1976_v42, %v796_v48  ;;  %v1788_v45 = vadd.f32 %v1787_v40, %v2706_v44  ;;  %v2570_v44 = vld [vmem:[#allocation2 + $0x258] sm:$0xff]  }
 0x4f9   :  { %v2307_v50 = vpop.f32.mrf.mxu1 }
 0x4fa   :  { %v808_v51 = vadd.f32 %v2307_v50, %v1976_v42  ;;  %815 = vxpose.xlu0.b32.start [1/2] (short) (narrow) %v797_v49, 8  ;;  %v2568_v49 = vld [vmem:[#allocation2 + $0x260] sm:$0xff]   ;;  %v1789_v50 = vrot.slane %v1788_v45, 2 }
 0x4fb   :  { %v799_v53 = vpop.f32.mrf.mxu1 }
 0x4fc   :  { %v800_v54 = vadd.f32 %v1976_v42, %v799_v53  ;;  %1367 = vxpose.xlu1.b32.end [2/2] (short) (narrow) %v808_v51, 8  ;;  %v1250_v42 = vrot.slane %v2708_v47, 4  ;;  %v2569_v51 = vld [vmem:[#allocation2 + $0x260] sm:$0xff]  }
 0x4fe   :  { %816 = vxpose.xlu0.b32.end [2/2] (short) (narrow) %v800_v54, 8  ;;  %v1251_v48 = vadd.f32 %v1250_v42, %v2708_v47  ;;  %v1790_v54 = vadd.f32 %v1789_v50, %v1788_v45 }
 0x500   :  { %v1252_v53 = vrot.slane %v1251_v48, 2 }
 0x502   :  { %v1253_v47 = vadd.f32 %v1252_v53, %v1251_v48 }
 0x515   :  { %v2752_v55 = vpop.f32.mrf.mxu1 }
 0x517   :  { %v2326_v56 = vpop.f32.mrf.mxu1 }
 0x518   :  { %v2571_v56 = vld [vmem:[#allocation2 + $0x258] sm:$0xff]  }
 0x519   :  { %v1043_v57 = vpop.f32.mrf.mxu1 }
 0x51a   :  { %v2572_v57 = vld [vmem:[#allocation2 + $0x250] sm:$0xff]  }
 0x51b   :  { %v2327_v59 = vpop.f32.mrf.mxu1 }
 0x51c   :  { %v1791_v59 = vrot.slane %v1790_v54, 1 }
 0x535   :  { %v2754_v60 = vpop.f32.mrf.mxu1 }
 0x537   :  { %v2366_v62 = vpop.f32.mrf.mxu1 }
 0x538   :  { %v2573_v62 = vld [vmem:[#allocation2 + $0x250] sm:$0xff]  }
 0x539   :  { %v1245_v63 = vpop.f32.mrf.mxu1 }
 0x53a   :  { %v1254_v63 = vrot.slane %v1253_v47, 1 }
 0x53b   :  { %v2367_v0 = vpop.f32.mrf.mxu1 }
 0x53c   :  { %v2574_v0 = vld [vmem:[#allocation2 + $0x248] sm:$0xff]  }
 0x574   :  { %v1382_v1 = vpop.trf.xlu1 }
 0x575   :  { %v1398_v4 = vpack.c.bf16 %v1382_v1, %v1382_v1  ;;  %v1792_v1 = vadd.f32 %v1791_v59, %v1790_v54 }
 0x576   :  { %v831_v5 = vpop.trf.xlu0 }
 0x577   :  { %v847_v8 = vpack.c.bf16 %v831_v5, %v831_v5  ;;  %2021 = vmatmul.mubr.msk.bf16.vlgmr.msra.gmra.mxu1 %vm858_vm1, %v1398_v4  ;;  %v1255_v4 = vadd.f32 %v1254_v63, %v1253_v47  ;;  %v2576_v5 = vld [vmem:[#allocation2 + $0x240] sm:$0xff]  }
 0x578   :  { %2409 = vmatpush3.bf16.msra.mxu1 %v2546_v2  ;;  %2424 = vmatprep.mubr.msk.bf16.mxu1 %vm2642_vm0, %v2641_v52  ;;  %v2575_v2 = vld [vmem:[#allocation2 + $0x248] sm:$0xff]   ;;  %v1985_v63 = vld [vmem:[%s2848_s2 + $0x6] sm:$0x1] }
 0x579   :  { %1988 = vmatmul.mubr.msk.bf16.vlgmr.msra.gmra.mxu0 %vm858_vm1, %v847_v8  ;;  %2410 = vmatprep.subr.bf16.mxu1 %v2641_v52  ;;  %v2577_v8 = vld [vmem:[#allocation2 + $0x240] sm:$0xff]  }
 0x57a   :  { %2329 = vmatpush3.bf16.msra.mxu0 %v2547_v7  ;;  %2344 = vmatprep.mubr.msk.bf16.mxu0 %vm2642_vm0, %v2641_v52  ;;  %v1793_v7 = vmul.f32 0.0625, %v1792_v1 }
 0x57b   :  { %2330 = vmatprep.subr.bf16.mxu0 %v2641_v52 }
 0x57c   :  { %2411 = vmatpush3.bf16.msra.mxu1 %v2548_v9  ;;  %v1256_v9 = vmul.f32 0.0625, %v1255_v4  ;;  %v1794_v10 = vpack.c.bf16 %v1793_v7, %v1793_v7 }
 0x57d   :  { %2412 = vmatprep.subr.bf16.mxu1 %v2641_v52 }
 0x57e   :  { %2331 = vmatpush3.bf16.msra.mxu0 %v2549_v11  ;;  %v2578_v11 = vld [vmem:[#allocation2 + $0x1f8] sm:$0xff]   ;;  %v1257_v12 = vpack.c.bf16 %v1256_v9, %v1256_v9 }
 0x57f   :  { %2332 = vmatprep.subr.bf16.mxu0 %v2641_v52 }
 0x580   :  { %2413 = vmatpush3.bf16.msra.mxu1 %v2550_v13  ;;  %v2579_v13 = vld [vmem:[#allocation2 + $0x1f0] sm:$0xff]  }
 0x581   :  { %2414 = vmatprep.subr.bf16.mxu1 %v2641_v52 }
 0x582   :  { %2333 = vmatpush3.bf16.msra.mxu0 %v2551_v15  ;;  %v2580_v15 = vld [vmem:[#allocation2 + $0x1e8] sm:$0xff]  }
 0x583   :  { %2334 = vmatprep.subr.bf16.mxu0 %v2641_v52 }
 0x584   :  { %2415 = vmatpush3.bf16.msra.mxu1 %v2552_v17  ;;  %v2581_v17 = vld [vmem:[#allocation2 + $0x1e0] sm:$0xff]  }
 0x585   :  { %2416 = vmatprep.subr.bf16.mxu1 %v2641_v52 }
 0x586   :  { %2335 = vmatpush3.bf16.msra.mxu0 %v2553_v20  ;;  %v2582_v20 = vld [vmem:[#allocation2 + $0x1d8] sm:$0xff]  }
 0x587   :  { %2336 = vmatprep.subr.bf16.mxu0 %v2641_v52 }
 0x588   :  { %2417 = vmatpush3.bf16.msra.mxu1 %v2554_v3  ;;  %v2583_v3 = vld [vmem:[#allocation2 + $0x1d0] sm:$0xff]  }
 0x589   :  { %2418 = vmatprep.subr.bf16.mxu1 %v2641_v52 }
 0x58a   :  { %2337 = vmatpush3.bf16.msra.mxu0 %v2555_v23  ;;  %v2584_v23 = vld [vmem:[#allocation2 + $0x1c8] sm:$0xff]  }
 0x58b   :  { %2338 = vmatprep.subr.bf16.mxu0 %v2641_v52 }
 0x58c   :  { %2419 = vmatpush3.bf16.msra.mxu1 %v2556_v24  ;;  %v1478_v24 = vmul.f32 0.0625, %v1477_v58 }
 0x58d   :  { %2420 = vmatprep.subr.bf16.mxu1 %v2641_v52 }
 0x58e   :  { %2339 = vmatpush3.bf16.msra.mxu0 %v2557_v26  ;;  %v1479_v26 = vpack.c.bf16 %v1478_v24, %v1478_v24 }
 0x58f   :  { %2340 = vmatprep.subr.bf16.mxu0 %v2641_v52 }
 0x590   :  { %2421 = vmatpush3.bf16.msra.mxu1 %v2558_v28  ;;  %v1673_v28 = vrot.slane %v2699_v19, 4 }
 0x591   :  { %2422 = vmatprep.subr.bf16.mxu1 %v2641_v52 }
 0x592   :  { %2341 = vmatpush3.bf16.msra.mxu0 %v2559_v30  ;;  %v1674_v30 = vadd.f32 %v1673_v28, %v2699_v19 }
 0x593   :  { %2342 = vmatprep.subr.bf16.mxu0 %v2641_v52 }
 0x594   :  { %2423 = vmatpush3.bf16.msra.mxu1 %v2560_v32  ;;  %v1675_v32 = vrot.slane %v1674_v30, 2 }
 0x595   :  { %2448 = vmatprep.subr.bf16.mxu1 %v2641_v52 }
 0x596   :  { %2343 = vmatpush3.bf16.msra.mxu0 %v2561_v34  ;;  %v1676_v34 = vadd.f32 %v1675_v32, %v1674_v30 }
 0x597   :  { %2425 = vmatmul.mubr.bf16.vlgmr.msra.gmra.mxu1 %v1454_v22  ;;  %2368 = vmatprep.subr.bf16.mxu0 %v2641_v52  ;;  %v2592_v22 = vld [vmem:[#allocation2 + $0x208] sm:$0xff]  }
 0x598   :  { %2449 = vmatpush3.bf16.msra.mxu1 %v2562_v36  ;;  %2464 = vmatprep.mubr.msk.bf16.mxu1 %vm2642_vm0, %v2641_v52  ;;  %v1677_v36 = vrot.slane %v1676_v34, 1 }
 0x599   :  { %2345 = vmatmul.mubr.bf16.vlgmr.msra.gmra.mxu0 %v914_v38  ;;  %2450 = vmatprep.subr.bf16.mxu1 %v2641_v52 }
 0x59a   :  { %2369 = vmatpush3.bf16.msra.mxu0 %v2563_v37  ;;  %2384 = vmatprep.mubr.msk.bf16.mxu0 %vm2642_vm0, %v2641_v52  ;;  %v1678_v19 = vadd.f32 %v1677_v36, %v1676_v34  ;;  %v2593_v37 = vld [vmem:[#allocation2 + $0x200] sm:$0xff]  }
 0x59b   :  { %2370 = vmatprep.subr.bf16.mxu0 %v2641_v52 }
 0x59c   :  { %2451 = vmatpush3.bf16.msra.mxu1 %v2564_v39  ;;  %v1679_v38 = vmul.f32 0.0625, %v1678_v19 }
 0x59d   :  { %2452 = vmatprep.subr.bf16.mxu1 %v2641_v52 }
 0x59e   :  { %2371 = vmatpush3.bf16.msra.mxu0 %v2565_v41  ;;  %v1680_v39 = vpack.c.bf16 %v1679_v38, %v1679_v38 }
 0x59f   :  { %2372 = vmatprep.subr.bf16.mxu0 %v2641_v52 }
 0x5a0   :  { %2453 = vmatpush3.bf16.msra.mxu1 %v2566_v43 }
 0x5a1   :  { %2454 = vmatprep.subr.bf16.mxu1 %v2641_v52 }
 0x5a2   :  { %2373 = vmatpush3.bf16.msra.mxu0 %v2567_v46 }
 0x5a3   :  { %2374 = vmatprep.subr.bf16.mxu0 %v2641_v52 }
 0x5a4   :  { %2455 = vmatpush3.bf16.msra.mxu1 %v2568_v49 }
 0x5a5   :  { %2456 = vmatprep.subr.bf16.mxu1 %v2641_v52 }
 0x5a6   :  { %2375 = vmatpush3.bf16.msra.mxu0 %v2569_v51 }
 0x5a7   :  { %2376 = vmatprep.subr.bf16.mxu0 %v2641_v52 }
 0x5a8   :  { %2457 = vmatpush3.bf16.msra.mxu1 %v2570_v44 }
 0x5a9   :  { %2458 = vmatprep.subr.bf16.mxu1 %v2641_v52 }
 0x5aa   :  { %2377 = vmatpush3.bf16.msra.mxu0 %v2571_v56 }
 0x5ab   :  { %2378 = vmatprep.subr.bf16.mxu0 %v2641_v52 }
 0x5ac   :  { %2459 = vmatpush3.bf16.msra.mxu1 %v2572_v57 }
 0x5ad   :  { %2460 = vmatprep.subr.bf16.mxu1 %v2641_v52 }
 0x5ae   :  { %2379 = vmatpush3.bf16.msra.mxu0 %v2573_v62 }
 0x5af   :  { %2380 = vmatprep.subr.bf16.mxu0 %v2641_v52 }
 0x5b0   :  { %2461 = vmatpush3.bf16.msra.mxu1 %v2574_v0 }
 0x5b1   :  { %2462 = vmatprep.subr.bf16.mxu1 %v2641_v52 }
 0x5b2   :  { %2381 = vmatpush3.bf16.msra.mxu0 %v2575_v2 }
 0x5b3   :  { %2382 = vmatprep.subr.bf16.mxu0 %v2641_v52 }
 0x5b4   :  { %2463 = vmatpush3.bf16.msra.mxu1 %v2576_v5 }
 0x5b6   :  { %2383 = vmatpush3.bf16.msra.mxu0 %v2577_v8 }
 0x5b7   :  { %2465 = vmatmul.mubr.bf16.vlgmr.msra.gmra.mxu1 %v1794_v10  ;;  %2388 = vmatprep.subr.bf16.mxu0 %v2641_v52 }
 0x5b9   :  { %2385 = vmatmul.mubr.bf16.vlgmr.msra.gmra.mxu0 %v1257_v12 }
 0x5ba   :  { %2389 = vmatpush3.bf16.msra.mxu0 %v2578_v11  ;;  %2404 = vmatprep.mubr.msk.bf16.mxu0 %vm2642_vm0, %v2641_v52 }
 0x5bb   :  { %2390 = vmatprep.subr.bf16.mxu0 %v2641_v52 }
 0x5be   :  { %2391 = vmatpush3.bf16.msra.mxu0 %v2579_v13 }
 0x5bf   :  { %2392 = vmatprep.subr.bf16.mxu0 %v2641_v52 }
 0x5c2   :  { %2393 = vmatpush3.bf16.msra.mxu0 %v2580_v15 }
 0x5c3   :  { %2394 = vmatprep.subr.bf16.mxu0 %v2641_v52 }
 0x5c6   :  { %2395 = vmatpush3.bf16.msra.mxu0 %v2581_v17 }
 0x5c7   :  { %2396 = vmatprep.subr.bf16.mxu0 %v2641_v52 }
 0x5ca   :  { %2397 = vmatpush3.bf16.msra.mxu0 %v2582_v20 }
 0x5cb   :  { %2398 = vmatprep.subr.bf16.mxu0 %v2641_v52 }
 0x5ce   :  { %2399 = vmatpush3.bf16.msra.mxu0 %v2583_v3 }
 0x5cf   :  { %2400 = vmatprep.subr.bf16.mxu0 %v2641_v52 }
 0x5d2   :  { %2401 = vmatpush3.bf16.msra.mxu0 %v2584_v23 }
 0x5d3   :  { %2402 = vmatprep.subr.bf16.mxu0 %v2641_v52 }
 0x5d6   :  { %2403 = vmatpush3.bf16.msra.mxu0 %v2585_v6 }
 0x5d7   :  { %2428 = vmatprep.subr.bf16.mxu0 %v2641_v52 }
 0x5d9   :  { %2405 = vmatmul.mubr.bf16.vlgmr.msra.gmra.mxu0 %v1479_v26 }
 0x5da   :  { %2429 = vmatpush3.bf16.msra.mxu0 %v2586_v25  ;;  %2444 = vmatprep.mubr.msk.bf16.mxu0 %vm2642_vm0, %v2641_v52 }
 0x5db   :  { %2430 = vmatprep.subr.bf16.mxu0 %v2641_v52 }
 0x5de   :  { %2431 = vmatpush3.bf16.msra.mxu0 %v2587_v27 }
 0x5df   :  { %2432 = vmatprep.subr.bf16.mxu0 %v2641_v52 }
 0x5e2   :  { %2433 = vmatpush3.bf16.msra.mxu0 %v2588_v29 }
 0x5e3   :  { %2434 = vmatprep.subr.bf16.mxu0 %v2641_v52 }
 0x5e6   :  { %2435 = vmatpush3.bf16.msra.mxu0 %v2589_v31 }
 0x5e7   :  { %2436 = vmatprep.subr.bf16.mxu0 %v2641_v52 }
 0x5ea   :  { %2437 = vmatpush3.bf16.msra.mxu0 %v2590_v33 }
 0x5eb   :  { %2438 = vmatprep.subr.bf16.mxu0 %v2641_v52 }
 0x5ee   :  { %2439 = vmatpush3.bf16.msra.mxu0 %v2591_v35 }
 0x5ef   :  { %2440 = vmatprep.subr.bf16.mxu0 %v2641_v52 }
 0x5f2   :  { %2441 = vmatpush3.bf16.msra.mxu0 %v2592_v22 }
 0x5f3   :  { %2442 = vmatprep.subr.bf16.mxu0 %v2641_v52 }
 0x5f6   :  { %2443 = vmatpush3.bf16.msra.mxu0 %v2593_v37 }
 0x5f9   :  { %2445 = vmatmul.mubr.bf16.vlgmr.msra.gmra.mxu0 %v1680_v39 }
 0x637   :  { %v1436_v40 = vpop.f32.mrf.mxu1 }
 0x638   :  { %2022 = vst [vmem:[%s2850_s4 + $0x10] sm:$0xff] %v1436_v40 }
 0x639   :  { %v896_v41 = vpop.f32.mrf.mxu0  ;;  %v1438_v42 = vpop.f32.mrf.mxu1 }
 0x63a   :  { %903 = vst [vmem:[%s2850_s4] sm:$0xff] %v896_v41  ;;  %2023 = vst [vmem:[%s2850_s4 + $0x18] sm:$0xff] %v1438_v42 }
 0x63b   :  { %v898_v52 = vpop.f32.mrf.mxu0  ;;  %v1440_v43 = vpop.f32.mrf.mxu1 }
 0x63c   :  { %904 = vst [vmem:[%s2850_s4 + $0x8] sm:$0xff] %v898_v52  ;;  %s2644_s4 = smov [#allocation5]  }
 0x63d   :  { %v900_v45 = vpop.f32.mrf.mxu0  ;;  %v1441_v46 = vpop.f32.mrf.mxu1  ;;  %s1910_s1 = sshll.u32 %s2644_s4, 4  ;;  %s1911_s1 = int_to_ptr.vmem [resolvable:$true] %s1910_s1 }
 0x63e   :  { %s2614_s2 = scalar_lea.vmem %s1911_s1, 32  ;;  %p2619_p6 = scmp.lt.s32.totalorder %s1911_s1, %s1911_s1 }
 0x63f   :  { %v901_v48 = vpop.f32.mrf.mxu0  ;;  %p2615_p5 = scmp.ne.s32.totalorder %s1911_s1, %s2614_s2  ;;  %p2620_p7 = scmp.lt.s32.totalorder %s2614_s2, %s2614_s2 }
 0x641   :  { %p2621_p8 = por %p2620_p7, %p2619_p6 }
 0x643   :  { %p2622_p9 = pnand %p2621_p8, %p2615_p5 }
 0x657   :  { %v1666_v49 = vpop.f32.mrf.mxu1 }
 0x659   :  { %v1128_v50 = vpop.f32.mrf.mxu0  ;;  %v2426_v51 = vpop.f32.mrf.mxu1 }
 0x65a   :  { %v1129_v57 = vadd.f32 %v1128_v50, %v2752_v55 }
 0x65b   :  { %v2346_v53 = vpop.f32.mrf.mxu0  ;;  %v1669_v44 = vpop.f32.mrf.mxu1 }
 0x65c   :  { %v1248_v62 = vadd.f32 %v2754_v60, %v1129_v57 }
 0x65d   :  { %v1131_v54 = vpop.f32.mrf.mxu0  ;;  %v2427_v56 = vpop.f32.mrf.mxu1 }
 0x65f   :  { %v2347_v47 = vpop.f32.mrf.mxu0 }
 0x677   :  { %v1893_v59 = vpop.f32.mrf.mxu1 }
 0x679   :  { %v1357_v0 = vpop.f32.mrf.mxu0  ;;  %v2466_v1 = vpop.f32.mrf.mxu1 }
 0x67a   :  { %v1363_v2 = vadd.f32 %v1357_v0, %v1248_v62 }
 0x67b   :  { %v2386_v4 = vpop.f32.mrf.mxu0  ;;  %v1896_v5 = vpop.f32.mrf.mxu1 }
 0x67c   :  { %v1364_v7 = vadd.f32 %v1985_v63, %v1363_v2 }
 0x67d   :  { %v1360_v8 = vpop.f32.mrf.mxu0  ;;  %v2467_v9 = vpop.f32.mrf.mxu1 }
 0x67e   :  { %1365 = vst [vmem:[#allocation5] sm:$0x1] %v1364_v7 }
 0x67f   :  { %v2387_v10 = vpop.f32.mrf.mxu0 }
 0x699   :  { %v1578_v11 = vpop.f32.mrf.mxu0 }
 0x69a   :  { %v1667_v14 = vadd.f32 %v1666_v49, %v1578_v11 }
 0x69b   :  { %v2406_v12 = vpop.f32.mrf.mxu0 }
 0x69d   :  { %v1581_v55 = vpop.f32.mrf.mxu0 }
 0x69f   :  { %v2407_v13 = vpop.f32.mrf.mxu0 }
 0x6b9   :  { %v1779_v60 = vpop.f32.mrf.mxu0 }
 0x6ba   :  { %v1785_v15 = vadd.f32 %v1779_v60, %v1667_v14 }
 0x6bb   :  { %v2446_v16 = vpop.f32.mrf.mxu0 }
 0x6bc   :  { %v1899_v17 = vadd.f32 %v1893_v59, %v1785_v15 }
 0x6bd   :  { %v1782_v18 = vpop.f32.mrf.mxu0 }
 0x6be   :  { %v1900_v20 = vadd.f32 %v1985_v63, %v1899_v17 }
 0x6bf   :  { %v2447_v61 = vpop.f32.mrf.mxu0 }
 0x6c0   :  { %1902 = vst [vmem:[#allocation5 + $0x1] sm:$0x1] %v1900_v20 }
 0x6c1   :  { %2625 = shalt.err (!%p2622_p9)
}
 0x6c2   :  { %s2645_s27 = smov 16   ;;  %s2646_s0 = smov 1  }
 0x6c3   :  { %1916 = dma.vmem_to_hbm [thread:$0]  %s1911_s1, 32, %s2851_s5, [#allocation4], %s2645_s27, %s2645_s27, %s2646_s0  }
 0x6c4   :  { %2636 = dma.done.wait [#allocation4], 32  }
 0x6c5   :  { %2637 = vsyncadd [#allocation4], 4294967264 }
 0x6c6   :  { %1922 = vsyncpa [#allocation3], 1 }
 0x6c7   :  { %1923 = vsyncpa [#allocation4], 1 }

</bundles_post_ra>
